<compile_context>
chip_gen: v7x
topology: tpu7x:2x2x1
jax: 0.10.0
libtpu: 0.0.40
codegen_flags: <defaults>
</compile_context>

<pallas_src>
import jax
import jax.numpy as jnp
from jax.experimental import pallas as pl
from jax.experimental.pallas import tpu as pltpu


def mlp_kernel(x_ref, w1_ref, b1_ref, w2_ref, b2_ref, w3_ref, b3_ref, o_ref):
    # fc1 + ReLU : cast x to bf16 in-kernel (VPU slots hide under the MXU work),
    # f32 accumulate / elementwise.
    x_bf = x_ref[...].astype(jnp.bfloat16)
    h1 = jnp.dot(x_bf, w1_ref[...], preferred_element_type=jnp.float32)
    h1 = jnp.maximum(h1 + b1_ref[...], 0.0)          # (TB,512) + (1,512)

    # TODO(synk): nn.Dropout() is identity in eval mode; training-mode masking
    # (p=0.5 with 1/(1-p) scaling) is not applied here.

    # fc2 + ReLU
    h2 = jnp.dot(h1.astype(jnp.bfloat16), w2_ref[...],
                 preferred_element_type=jnp.float32)
    h2 = jnp.maximum(h2 + b2_ref[...], 0.0)

    # fc3 (class dim padded to 128 lanes; padded columns carry -1e30 bias)
    logits = jnp.dot(h2.astype(jnp.bfloat16), w3_ref[...],
                     preferred_element_type=jnp.float32)
    logits = logits + b3_ref[...]

    # softmax over the (padded) class dim; masked lanes exp() to exactly 0.
    # Exact divide for the normalization (approx reciprocal breaks row-sum==1).
    m = jnp.max(logits, axis=-1, keepdims=True)
    e = jnp.exp(logits - m)
    s = jnp.sum(e, axis=-1, keepdims=True)
    o_ref[...] = (e / s).astype(o_ref.dtype)


def _round_up(n, m):
    return ((n + m - 1) // m) * m


def mlp_forward(x_nchw, params, *, tb=256):
    w1, b1, w2, b2, w3, b3 = params
    B = x_nchw.shape[0]
    x_flat = x_nchw.reshape(B, -1)                   # nn.Flatten()
    D = x_flat.shape[1]
    H1 = w1.shape[1]
    H2 = w2.shape[1]
    C = w3.shape[1]

    # --- lane-dense class dim: pad C up to a multiple of 128 ----------------
    CP = _round_up(C, 128)
    w3_p = jnp.pad(w3, ((0, 0), (0, CP - C)))
    b3_p = jnp.pad(b3, ((0, 0), (0, CP - C)), constant_values=-1e30)

    # --- adaptive batch tile -------------------------------------------------
    # Small B: shrink to a 16-row tile (bf16 sublane pack) so we don't pad
    # 2 rows up to 128.  Large B: use tb (multiple of 128).  Prefer >=2 grid
    # steps so v7x's two TensorCores both get work.
    TB = min(tb, _round_up(B, 16))
    if B > 16 and _round_up(B, TB) // TB < 2:
        TB = max(16, _round_up((B + 1) // 2, 16))
    B_pad = _round_up(B, TB)
    if B_pad != B:
        x_flat = jnp.pad(x_flat, ((0, B_pad - B), (0, 0)))

    # --- bf16 MXU operands for the weights; biases and x stay f32 -----------
    w1_bf = w1.astype(jnp.bfloat16)
    w2_bf = w2.astype(jnp.bfloat16)
    w3_bf = w3_p.astype(jnp.bfloat16)

    grid = (B_pad // TB,)

    # VMEM-resident weights/biases: block index never changes, so a single
    # pipeline buffer suffices (saves ~1.3 MiB of dead double-buffer VMEM).
    resident = lambda shape: pl.BlockSpec(shape, lambda i: (0, 0),
                                          pipeline_mode=pl.Buffered(1))

    flops = 2 * B_pad * (D * H1 + H1 * H2 + H2 * CP)
    bytes_accessed = (B_pad * D * 4                          # x (f32)
                      + (D * H1 + H1 * H2 + H2 * CP) * 2     # bf16 weights
                      + (H1 + H2 + CP) * 4                   # f32 biases
                      + B_pad * CP * 4)                      # f32 output
    cost = pl.CostEstimate(flops=flops,
                           transcendentals=B_pad * CP,
                           bytes_accessed=bytes_accessed)

    out = pl.pallas_call(
        mlp_kernel,
        out_shape=jax.ShapeDtypeStruct((B_pad, CP), jnp.float32),
        grid_spec=pltpu.PrefetchScalarGridSpec(
            num_scalar_prefetch=0,
            grid=grid,
            in_specs=[
                pl.BlockSpec((TB, D), lambda i: (i, 0)),   # x tile (pipelined)
                resident((D, H1)), resident((1, H1)),      # fc1 (VMEM-resident)
                resident((H1, H2)), resident((1, H2)),     # fc2
                resident((H2, CP)), resident((1, CP)),     # fc3 (padded)
            ],
            out_specs=pl.BlockSpec((TB, CP), lambda i: (i, 0)),
        ),
        compiler_params=pltpu.CompilerParams(
            dimension_semantics=("parallel",),             # v7x: 2 TCs
            vmem_limit_bytes=32 * 1024 * 1024,             # sized for v7x VMEM
        ),
        cost_estimate=cost,
    )(x_flat, w1_bf, b1, w2_bf, b2, w3_bf, b3_p)

    return out[:B, :C]


def init_params(key, d_in, n_class):
    # PyTorch nn.Linear default init: U(-1/sqrt(fan_in), 1/sqrt(fan_in))
    def linear(k, fan_in, fan_out):
        kw, kb = jax.random.split(k)
        bound = 1.0 / (fan_in ** 0.5)
        w = jax.random.uniform(kw, (fan_in, fan_out), jnp.float32, -bound, bound)
        b = jax.random.uniform(kb, (1, fan_out), jnp.float32, -bound, bound)
        return w, b

    k1, k2, k3 = jax.random.split(key, 3)
    w1, b1 = linear(k1, d_in, 512)
    w2, b2 = linear(k2, 512, 256)
    w3, b3 = linear(k3, 256, n_class)
    return (w1, b1, w2, b2, w3, b3)


if __name__ == "__main__":
    key = jax.random.PRNGKey(0)
    kx, kp = jax.random.split(key)

    B, C, H, W = 2, 4, 16, 16          # NCHW, flattened D = 1024
    n_class = 10

    x = jax.random.normal(kx, (B, C, H, W), jnp.float32)
    params = init_params(kp, C * H * W, n_class)

    out = mlp_forward(x, params)
    out = jax.block_until_ready(out)

    assert out.shape == (B, n_class)
    # softmax rows sum to 1 (padded classes contribute exactly 0; exact divide)
    assert bool(jnp.allclose(jnp.sum(out, axis=-1), 1.0, atol=1e-5))
    assert bool(jnp.all(jnp.isfinite(out)))
    assert bool(jnp.all(out >= 0.0))

    print("KERNEL_OK")
</pallas_src>

<mosaic_0001>
module attributes {stable_mosaic.version = 11 : i64} {
  func.func @mlp_kernel(%arg0: i32, %arg1: memref<16x1024xf32, #tpu.memory_space<vmem>>, %arg2: memref<1024x512xbf16, #tpu.memory_space<vmem>>, %arg3: memref<1x512xf32, #tpu.memory_space<vmem>>, %arg4: memref<512x256xbf16, #tpu.memory_space<vmem>>, %arg5: memref<1x256xf32, #tpu.memory_space<vmem>>, %arg6: memref<256x128xbf16, #tpu.memory_space<vmem>>, %arg7: memref<1x128xf32, #tpu.memory_space<vmem>>, %arg8: memref<16x128xf32, #tpu.memory_space<vmem>>) attributes {dimension_semantics = [#tpu.dimension_semantics<parallel>], iteration_bounds = array<i64: 1>, scalar_prefetch = 0 : i64, scratch_operands = 0 : i64, tpu.core_type = #tpu.core_type<tc>, window_params = [{transform_indices = @transform_0, window_bounds = array<i64: 16, 1024>}, {pipeline_mode = #tpu.pipeline_mode<synchronous>, transform_indices = @transform_1, window_bounds = array<i64: 1024, 512>}, {pipeline_mode = #tpu.pipeline_mode<synchronous>, transform_indices = @transform_2, window_bounds = array<i64: 1, 512>}, {pipeline_mode = #tpu.pipeline_mode<synchronous>, transform_indices = @transform_3, window_bounds = array<i64: 512, 256>}, {pipeline_mode = #tpu.pipeline_mode<synchronous>, transform_indices = @transform_4, window_bounds = array<i64: 1, 256>}, {pipeline_mode = #tpu.pipeline_mode<synchronous>, transform_indices = @transform_5, window_bounds = array<i64: 256, 128>}, {pipeline_mode = #tpu.pipeline_mode<synchronous>, transform_indices = @transform_6, window_bounds = array<i64: 1, 128>}, {transform_indices = @transform_7, window_bounds = array<i64: 16, 128>}]} {
    %c0 = arith.constant 0 : index
    %c0_0 = arith.constant 0 : index
    %0 = vector.load %arg1[%c0, %c0_0] : memref<16x1024xf32, #tpu.memory_space<vmem>>, vector<16x1024xf32>
    %1 = arith.truncf %0 : vector<16x1024xf32> to vector<16x1024xbf16>
    %c0_1 = arith.constant 0 : index
    %c0_2 = arith.constant 0 : index
    %2 = vector.load %arg2[%c0_1, %c0_2] : memref<1024x512xbf16, #tpu.memory_space<vmem>>, vector<1024x512xbf16>
    %cst = arith.constant dense<0.000000e+00> : vector<16x512xf32>
    %3 = tpu.matmul %1, %2, %cst {dimension_numbers = #tpu.dot_dimension_numbers<[1], [0], [0], [1], [0, 0, 1, 1], [], []>} : vector<16x1024xbf16>, vector<1024x512xbf16>, vector<16x512xf32> -> vector<16x512xf32>
    %c0_3 = arith.constant 0 : index
    %c0_4 = arith.constant 0 : index
    %4 = vector.load %arg3[%c0_3, %c0_4] : memref<1x512xf32, #tpu.memory_space<vmem>>, vector<1x512xf32>
    %5 = vector.broadcast %4 : vector<1x512xf32> to vector<16x512xf32>
    %6 = arith.addf %3, %5 : vector<16x512xf32>
    %cst_5 = arith.constant 0.000000e+00 : f32
    %7 = vector.broadcast %cst_5 : f32 to vector<16x512xf32>
    %8 = arith.maximumf %6, %7 : vector<16x512xf32>
    %9 = arith.truncf %8 : vector<16x512xf32> to vector<16x512xbf16>
    %c0_6 = arith.constant 0 : index
    %c0_7 = arith.constant 0 : index
    %10 = vector.load %arg4[%c0_6, %c0_7] : memref<512x256xbf16, #tpu.memory_space<vmem>>, vector<512x256xbf16>
    %cst_8 = arith.constant dense<0.000000e+00> : vector<16x256xf32>
    %11 = tpu.matmul %9, %10, %cst_8 {dimension_numbers = #tpu.dot_dimension_numbers<[1], [0], [0], [1], [0, 0, 1, 1], [], []>} : vector<16x512xbf16>, vector<512x256xbf16>, vector<16x256xf32> -> vector<16x256xf32>
    %c0_9 = arith.constant 0 : index
    %c0_10 = arith.constant 0 : index
    %12 = vector.load %arg5[%c0_9, %c0_10] : memref<1x256xf32, #tpu.memory_space<vmem>>, vector<1x256xf32>
    %13 = vector.broadcast %12 : vector<1x256xf32> to vector<16x256xf32>
    %14 = arith.addf %11, %13 : vector<16x256xf32>
    %cst_11 = arith.constant 0.000000e+00 : f32
    %15 = vector.broadcast %cst_11 : f32 to vector<16x256xf32>
    %16 = arith.maximumf %14, %15 : vector<16x256xf32>
    %17 = arith.truncf %16 : vector<16x256xf32> to vector<16x256xbf16>
    %c0_12 = arith.constant 0 : index
    %c0_13 = arith.constant 0 : index
    %18 = vector.load %arg6[%c0_12, %c0_13] : memref<256x128xbf16, #tpu.memory_space<vmem>>, vector<256x128xbf16>
    %cst_14 = arith.constant dense<0.000000e+00> : vector<16x128xf32>
    %19 = tpu.matmul %17, %18, %cst_14 {dimension_numbers = #tpu.dot_dimension_numbers<[1], [0], [0], [1], [0, 0, 1, 1], [], []>} : vector<16x256xbf16>, vector<256x128xbf16>, vector<16x128xf32> -> vector<16x128xf32>
    %c0_15 = arith.constant 0 : index
    %c0_16 = arith.constant 0 : index
    %20 = vector.load %arg7[%c0_15, %c0_16] : memref<1x128xf32, #tpu.memory_space<vmem>>, vector<1x128xf32>
    %21 = vector.broadcast %20 : vector<1x128xf32> to vector<16x128xf32>
    %22 = arith.addf %19, %21 : vector<16x128xf32>
    %cst_17 = arith.constant dense<0xFF800000> : vector<16xf32>
    %23 = vector.multi_reduction <maximumf>, %22, %cst_17 [1] : vector<16x128xf32> to vector<16xf32>
    %24 = vector.shape_cast %23 : vector<16xf32> to vector<16x1xf32>
    %25 = vector.broadcast %24 : vector<16x1xf32> to vector<16x128xf32>
    %26 = arith.subf %22, %25 : vector<16x128xf32>
    %27 = math.exp %26 : vector<16x128xf32>
    %cst_18 = arith.constant dense<0.000000e+00> : vector<16xf32>
    %28 = vector.multi_reduction <add>, %27, %cst_18 [1] : vector<16x128xf32> to vector<16xf32>
    %29 = vector.shape_cast %28 : vector<16xf32> to vector<16x1xf32>
    %30 = vector.broadcast %29 : vector<16x1xf32> to vector<16x128xf32>
    %31 = arith.divf %27, %30 : vector<16x128xf32>
    %c0_19 = arith.constant 0 : index
    %c0_20 = arith.constant 0 : index
    %32 = vector.load %arg8[%c0_19, %c0_20] : memref<16x128xf32, #tpu.memory_space<vmem>>, vector<16x128xf32>
    tpu.vector_store %arg8[%c0_19, %c0_20], %31 {strides = array<i32>} : memref<16x128xf32, #tpu.memory_space<vmem>>, vector<16x128xf32>,
    return
  }
  func.func @transform_0(%arg0: i32) -> (i32, i32) {
    %c0_i32 = arith.constant 0 : i32
    %c0_i32_0 = arith.constant 0 : i32
    return %arg0, %c0_i32 : i32, i32
  }
  func.func @transform_1(%arg0: i32) -> (i32, i32) {
    %c0_i32 = arith.constant 0 : i32
    %c0_i32_0 = arith.constant 0 : i32
    %c0_i32_1 = arith.constant 0 : i32
    return %c0_i32, %c0_i32_0 : i32, i32
  }
  func.func @transform_2(%arg0: i32) -> (i32, i32) {
    %c0_i32 = arith.constant 0 : i32
    %c0_i32_0 = arith.constant 0 : i32
    %c0_i32_1 = arith.constant 0 : i32
    return %c0_i32, %c0_i32_0 : i32, i32
  }
  func.func @transform_3(%arg0: i32) -> (i32, i32) {
    %c0_i32 = arith.constant 0 : i32
    %c0_i32_0 = arith.constant 0 : i32
    %c0_i32_1 = arith.constant 0 : i32
    return %c0_i32, %c0_i32_0 : i32, i32
  }
  func.func @transform_4(%arg0: i32) -> (i32, i32) {
    %c0_i32 = arith.constant 0 : i32
    %c0_i32_0 = arith.constant 0 : i32
    %c0_i32_1 = arith.constant 0 : i32
    return %c0_i32, %c0_i32_0 : i32, i32
  }
  func.func @transform_5(%arg0: i32) -> (i32, i32) {
    %c0_i32 = arith.constant 0 : i32
    %c0_i32_0 = arith.constant 0 : i32
    %c0_i32_1 = arith.constant 0 : i32
    return %c0_i32, %c0_i32_0 : i32, i32
  }
  func.func @transform_6(%arg0: i32) -> (i32, i32) {
    %c0_i32 = arith.constant 0 : i32
    %c0_i32_0 = arith.constant 0 : i32
    %c0_i32_1 = arith.constant 0 : i32
    return %c0_i32, %c0_i32_0 : i32, i32
  }
  func.func @transform_7(%arg0: i32) -> (i32, i32) {
    %c0_i32 = arith.constant 0 : i32
    %c0_i32_0 = arith.constant 0 : i32
    return %arg0, %c0_i32 : i32, i32
  }
}

</mosaic_0001>

<bundles_post_ra>
// kernel: tpu_custom_call.1
= control target key start
LH: loop header
LB: loop body
LE: loop exit
PB: predicated region body
PF: predicated region fallthrough
CT: control target
= control target key end

     0   :  { %12 = vsyncpa [#allocation3], 0  ;;  %s3939_s0 = inlined_call_operand.hbm [shape: f32[16,1024], index: 0, kind: input, shape index: {}]   ;;  %s3940_s1 = inlined_call_operand.hbm [shape: bf16[1024,512], index: 1, kind: input, shape index: {}]   ;;  %s3941_s2 = inlined_call_operand.vmem [shape: f32[1,512], index: 2, kind: input, shape index: {}]   ;;  %s3942_s3 = inlined_call_operand.hbm [shape: bf16[512,256], index: 3, kind: input, shape index: {}]   ;;  %s3943_s4 = inlined_call_operand.vmem [shape: f32[1,256], index: 4, kind: input, shape index: {}]   ;;  %s3944_s5 = inlined_call_operand.hbm [shape: bf16[256,128], index: 5, kind: input, shape index: {}]   ;;  %s3945_s6 = inlined_call_operand.vmem [shape: f32[1,128], index: 6, kind: input, shape index: {}]   ;;  %s3946_s7 = inlined_call_operand.hbm [shape: f32[16,128], index: 7, kind: output, shape index: {}]  }
   0x1   :  { %13 = vsyncpa [#allocation6], 0 }
   0x2   :  { %14 = vsyncpa [#allocation9], 0 }
   0x3   :  { %15 = vsyncpa [#allocation4], 0  ;;  %s3757_s24 = smov [#allocation5]   ;;  %s3639_s28 = scalar_lea.hbm %s3940_s1, 32768 }
   0x4   :  { %s33_s25 = sshll.u32 %s3757_s24, 4  ;;  %p3640_p0 = scmp.ne.s32.totalorder %s3940_s1, %s3639_s28  ;;  %s34_s25 = int_to_ptr.vmem [resolvable:$true] %s33_s25 }
   0x5   :  { %p3643_p1 = scmp.lt.u32.totalorder %s3639_s28, %s3940_s1 }
   0x7   :  { %p3645_p2 = pnand %p3643_p1, %p3640_p0 }
   0x9   :  { %3648 = shalt.err (!%p3645_p2)
}
   0xa   :  { %s3649_s10 = scalar_lea.vmem %s34_s25, 32768  ;;  %p3654_p4 = scmp.lt.s32.totalorder %s34_s25, %s34_s25 }
   0xb   :  { %p3650_p3 = scmp.ne.s32.totalorder %s34_s25, %s3649_s10  ;;  %p3655_p5 = scmp.lt.s32.totalorder %s3649_s10, %s3649_s10 }
   0xd   :  { %p3656_p6 = por %p3655_p5, %p3654_p4 }
   0xf   :  { %p3657_p7 = pnand %p3656_p6, %p3650_p3 }
  0x11   :  { %3660 = shalt.err (!%p3657_p7)
}
  0x12   :  { %s3758_s11 = smov 256   ;;  %s3759_s12 = smov 16  }
  0x13   :  { %39 = dma.hbm_to_vmem [thread:$0]  %s3940_s1, 32768, %s34_s25, [#allocation6], %s3758_s11, %s3758_s11, %s3759_s12  }
  0x14   :  { %s3760_s15 = smov [#allocation2]   ;;  %s3661_s19 = scalar_lea.hbm %s3939_s0, 2048 }
  0x15   :  { %s21_s16 = sshll.u32 %s3760_s15, 4  ;;  %p3662_p8 = scmp.ne.s32.totalorder %s3939_s0, %s3661_s19  ;;  %s22_s16 = int_to_ptr.vmem [resolvable:$true] %s21_s16 }
  0x16   :  { %p3665_p9 = scmp.lt.u32.totalorder %s3661_s19, %s3939_s0 }
  0x18   :  { %p3667_p10 = pnand %p3665_p9, %p3662_p8 }
  0x1a   :  { %3670 = shalt.err (!%p3667_p10)
}
  0x1b   :  { %s3671_s24 = scalar_lea.vmem %s22_s16, 2048  ;;  %p3676_p12 = scmp.lt.s32.totalorder %s22_s16, %s22_s16 }
  0x1c   :  { %p3672_p11 = scmp.ne.s32.totalorder %s22_s16, %s3671_s24  ;;  %p3677_p13 = scmp.lt.s32.totalorder %s3671_s24, %s3671_s24 }
  0x1e   :  { %p3678_p0 = por %p3677_p13, %p3676_p12 }
  0x20   :  { %p3679_p1 = pnand %p3678_p0, %p3672_p11 }
  0x22   :  { %3682 = shalt.err (!%p3679_p1)
}
  0x23   :  { %s3761_s1 = smov 1024   ;;  %s3762_s25 = smov 64  }
  0x24   :  { %27 = dma.hbm_to_vmem [thread:$0]  %s3939_s0, 2048, %s22_s16, [#allocation3], %s3761_s1, %s3761_s1, %s3762_s25  }
  0x25   :  { %s3763_s28 = smov [#allocation7]   ;;  %s3683_s9 = scalar_lea.hbm %s3942_s3, 8192 }
  0x26   :  { %s47_s29 = sshll.u32 %s3763_s28, 4  ;;  %p3684_p2 = scmp.ne.s32.totalorder %s3942_s3, %s3683_s9  ;;  %s48_s29 = int_to_ptr.vmem [resolvable:$true] %s47_s29 }
  0x27   :  { %p3687_p3 = scmp.lt.u32.totalorder %s3683_s9, %s3942_s3 }
  0x29   :  { %p3689_p4 = pnand %p3687_p3, %p3684_p2 }
  0x2b   :  { %3692 = shalt.err (!%p3689_p4)
}
  0x2c   :  { %s3693_s14 = scalar_lea.vmem %s48_s29, 8192  ;;  %p3698_p6 = scmp.lt.s32.totalorder %s48_s29, %s48_s29 }
  0x2d   :  { %p3694_p5 = scmp.ne.s32.totalorder %s48_s29, %s3693_s14  ;;  %p3699_p7 = scmp.lt.s32.totalorder %s3693_s14, %s3693_s14 }
  0x2f   :  { %p3700_p8 = por %p3699_p7, %p3698_p6 }
  0x31   :  { %p3701_p9 = pnand %p3700_p8, %p3694_p5 }
  0x33   :  { %3704 = shalt.err (!%p3701_p9)
}
  0x34   :  { %s3764_s0 = smov 128   ;;  %s3765_s15 = smov 8  }
  0x35   :  { %53 = dma.hbm_to_vmem [thread:$0]  %s3942_s3, 8192, %s48_s29, [#allocation6], %s3764_s0, %s3764_s0, %s3765_s15  }
  0x36   :  { %s3766_s18 = smov [#allocation8]   ;;  %s3705_s22 = scalar_lea.hbm %s3944_s5, 2048 }
  0x37   :  { %s61_s19 = sshll.u32 %s3766_s18, 4  ;;  %p3706_p10 = scmp.ne.s32.totalorder %s3944_s5, %s3705_s22  ;;  %s62_s19 = int_to_ptr.vmem [resolvable:$true] %s61_s19 }
  0x38   :  { %p3709_p11 = scmp.lt.u32.totalorder %s3705_s22, %s3944_s5 }
  0x3a   :  { %p3711_p12 = pnand %p3709_p11, %p3706_p10 }
  0x3c   :  { %3714 = shalt.err (!%p3711_p12)
}
  0x3d   :  { %s3715_s27 = scalar_lea.vmem %s62_s19, 2048  ;;  %p3720_p0 = scmp.lt.s32.totalorder %s62_s19, %s62_s19 }
  0x3e   :  { %p3716_p13 = scmp.ne.s32.totalorder %s62_s19, %s3715_s27  ;;  %p3721_p1 = scmp.lt.s32.totalorder %s3715_s27, %s3715_s27 }
  0x40   :  { %p3722_p2 = por %p3721_p1, %p3720_p0 }
  0x42   :  { %p3723_p3 = pnand %p3722_p2, %p3716_p13 }
  0x44   :  { %3726 = shalt.err (!%p3723_p3)
}
  0x45   :  { %s3767_s3 = smov 4  }
  0x46   :  { %67 = dma.hbm_to_vmem [thread:$0]  %s3944_s5, 2048, %s62_s19, [#allocation9], %s3762_s25, %s3762_s25, %s3767_s3  }
  0x47   :  { %3749 = dma.done.wait [#allocation3], 2048  }
  0x48   :  { %3750 = vsyncadd [#allocation3], 4294965248 }
  0x49   :  { %3751 = dma.done.wait [#allocation6], 40960  }
  0x4a   :  { %3752 = vsyncadd [#allocation6], 4294926336 }
  0x4b   :  { %3753 = dma.done.wait [#allocation9], 2048  }
  0x4c   :  { %3754 = vsyncadd [#allocation9], 4294965248  ;;  %v3135_v0 = vld [vmem:[#allocation5 + $0x4] ss:$16 sps:$4 sm:$0xff]   ;;  %v3139_v2 = vld [vmem:[#allocation5] ss:$16 sps:$4 sm:$0xff]  }
  0x4d   :  { %v3137_v1 = vld [vmem:[#allocation5 + $0x204] ss:$16 sps:$4 sm:$0xff]   ;;  %1665 = vmatprep.subr.bf16.mxu1 %v3135_v0  ;;  %v3140_v3 = vld [vmem:[#allocation5 + $0x200] ss:$16 sps:$4 sm:$0xff]   ;;  %v84_v46 = vld [vmem:[#allocation2 + $0x8] sm:$0xff] }
  0x4e   :  { %1708 = vmatprep.subr.bf16.mxu0 %v3137_v1  ;;  %v3141_v4 = vld [vmem:[#allocation5 + $0x24] ss:$16 sps:$4 sm:$0xff]   ;;  %1666 = vmatpush1.bf16.msra.mxu1 %v3139_v2  ;;  %v3145_v6 = vld [vmem:[#allocation5 + $0x20] ss:$16 sps:$4 sm:$0xff]   ;;  %v92_v49 = vld [vmem:[#allocation2 + $0x48] sm:$0xff] }
  0x4f   :  { %1709 = vmatpush1.bf16.msra.mxu0 %v3140_v3  ;;  %v3143_v5 = vld [vmem:[#allocation5 + $0x224] ss:$16 sps:$4 sm:$0xff]   ;;  %1667 = vmatprep.subr.bf16.mxu1 %v3141_v4  ;;  %v3146_v7 = vld [vmem:[#allocation5 + $0x220] ss:$16 sps:$4 sm:$0xff]   ;;  %v3863_v50 = vpack.c.bf16 %v92_v49, %v84_v46  ;;  %v86_v51 = vld [vmem:[#allocation2 + $0x18] sm:$0xff] }
  0x50   :  { %1710 = vmatprep.subr.bf16.mxu0 %v3143_v5  ;;  %v3147_v8 = vld [vmem:[#allocation5 + $0x44] ss:$16 sps:$4 sm:$0xff]   ;;  %v3151_v10 = vld [vmem:[#allocation5 + $0x40] ss:$16 sps:$4 sm:$0xff]   ;;  %v94_v52 = vld [vmem:[#allocation2 + $0x58] sm:$0xff] }
  0x51   :  { %v3149_v9 = vld [vmem:[#allocation5 + $0x244] ss:$16 sps:$4 sm:$0xff]   ;;  %v3152_v11 = vld [vmem:[#allocation5 + $0x240] ss:$16 sps:$4 sm:$0xff]   ;;  %v3865_v55 = vpack.c.bf16 %v94_v52, %v86_v51  ;;  %1697 = vmatprep.mubr.bf16.mxu1 %v3863_v50  ;;  %v3276_v46 = vld [vmem:[#allocation5 + $0xe8] ss:$16 sps:$4 sm:$0xff]  }
  0x52   :  { %1668 = vmatpush1.bf16.msra.mxu1 %v3145_v6  ;;  %v3153_v12 = vld [vmem:[#allocation5 + $0x64] ss:$16 sps:$4 sm:$0xff]   ;;  %v3157_v14 = vld [vmem:[#allocation5 + $0x60] ss:$16 sps:$4 sm:$0xff]   ;;  %v3290_v52 = vld [vmem:[#allocation5 + $0x12c] ss:$16 sps:$4 sm:$0xff]  }
  0x53   :  { %1711 = vmatpush1.bf16.msra.mxu0 %v3146_v7  ;;  %1669 = vmatprep.subr.bf16.mxu1 %v3147_v8  ;;  %v3155_v13 = vld [vmem:[#allocation5 + $0x264] ss:$16 sps:$4 sm:$0xff]   ;;  %v3158_v15 = vld [vmem:[#allocation5 + $0x260] ss:$16 sps:$4 sm:$0xff]  }
  0x54   :  { %1712 = vmatprep.subr.bf16.mxu0 %v3149_v9  ;;  %v3159_v16 = vld [vmem:[#allocation5 + $0x84] ss:$16 sps:$4 sm:$0xff]   ;;  %v3163_v18 = vld [vmem:[#allocation5 + $0x80] ss:$16 sps:$4 sm:$0xff]   ;;  %1740 = vmatprep.mubr.bf16.mxu0 %v3865_v55 }
  0x55   :  { %v3161_v17 = vld [vmem:[#allocation5 + $0x284] ss:$16 sps:$4 sm:$0xff]   ;;  %v3164_v19 = vld [vmem:[#allocation5 + $0x280] ss:$16 sps:$4 sm:$0xff]  }
  0x56   :  { %1670 = vmatpush1.bf16.msra.mxu1 %v3151_v10  ;;  %v3165_v20 = vld [vmem:[#allocation5 + $0xa4] ss:$16 sps:$4 sm:$0xff]   ;;  %v3169_v22 = vld [vmem:[#allocation5 + $0xa0] ss:$16 sps:$4 sm:$0xff]  }
  0x57   :  { %1713 = vmatpush1.bf16.msra.mxu0 %v3152_v11  ;;  %1671 = vmatprep.subr.bf16.mxu1 %v3153_v12  ;;  %v3167_v21 = vld [vmem:[#allocation5 + $0x2a4] ss:$16 sps:$4 sm:$0xff]   ;;  %v3170_v23 = vld [vmem:[#allocation5 + $0x2a0] ss:$16 sps:$4 sm:$0xff]   ;;  %v3236_v11 = vld [vmem:[#allocation5 + $0xc] ss:$16 sps:$4 sm:$0xff]  }
  0x58   :  { %1714 = vmatprep.subr.bf16.mxu0 %v3155_v13  ;;  %v3171_v24 = vld [vmem:[#allocation5 + $0xc4] ss:$16 sps:$4 sm:$0xff]   ;;  %v3175_v26 = vld [vmem:[#allocation5 + $0xc0] ss:$16 sps:$4 sm:$0xff]  }
  0x59   :  { %v3173_v25 = vld [vmem:[#allocation5 + $0x2c4] ss:$16 sps:$4 sm:$0xff]   ;;  %v3176_v27 = vld [vmem:[#allocation5 + $0x2c0] ss:$16 sps:$4 sm:$0xff]  }
  0x5a   :  { %1672 = vmatpush1.bf16.msra.mxu1 %v3157_v14  ;;  %v3177_v28 = vld [vmem:[#allocation5 + $0xe4] ss:$16 sps:$4 sm:$0xff]   ;;  %v3181_v30 = vld [vmem:[#allocation5 + $0xe0] ss:$16 sps:$4 sm:$0xff]   ;;  %v3234_v14 = vld [vmem:[#allocation5 + $0x8] ss:$16 sps:$4 sm:$0xff]  }
  0x5b   :  { %1715 = vmatpush1.bf16.msra.mxu0 %v3158_v15  ;;  %1673 = vmatprep.subr.bf16.mxu1 %v3159_v16  ;;  %v3179_v29 = vld [vmem:[#allocation5 + $0x2e4] ss:$16 sps:$4 sm:$0xff]   ;;  %v3182_v31 = vld [vmem:[#allocation5 + $0x2e0] ss:$16 sps:$4 sm:$0xff]  }
  0x5c   :  { %1716 = vmatprep.subr.bf16.mxu0 %v3161_v17  ;;  %v3183_v32 = vld [vmem:[#allocation5 + $0x104] ss:$16 sps:$4 sm:$0xff]   ;;  %v3187_v34 = vld [vmem:[#allocation5 + $0x100] ss:$16 sps:$4 sm:$0xff]   ;;  %v3242_v17 = vld [vmem:[#allocation5 + $0x2c] ss:$16 sps:$4 sm:$0xff]  }
  0x5d   :  { %v3185_v33 = vld [vmem:[#allocation5 + $0x304] ss:$16 sps:$4 sm:$0xff]   ;;  %v3188_v35 = vld [vmem:[#allocation5 + $0x300] ss:$16 sps:$4 sm:$0xff]  }
  0x5e   :  { %1674 = vmatpush1.bf16.msra.mxu1 %v3163_v18  ;;  %v3189_v36 = vld [vmem:[#allocation5 + $0x124] ss:$16 sps:$4 sm:$0xff]   ;;  %v3193_v38 = vld [vmem:[#allocation5 + $0x120] ss:$16 sps:$4 sm:$0xff]  }
  0x5f   :  { %1717 = vmatpush1.bf16.msra.mxu0 %v3164_v19  ;;  %1675 = vmatprep.subr.bf16.mxu1 %v3165_v20  ;;  %v3191_v37 = vld [vmem:[#allocation5 + $0x324] ss:$16 sps:$4 sm:$0xff]   ;;  %v3194_v39 = vld [vmem:[#allocation5 + $0x320] ss:$16 sps:$4 sm:$0xff]   ;;  %v3240_v19 = vld [vmem:[#allocation5 + $0x28] ss:$16 sps:$4 sm:$0xff]  }
  0x60   :  { %1718 = vmatprep.subr.bf16.mxu0 %v3167_v21  ;;  %v3195_v40 = vld [vmem:[#allocation5 + $0x144] ss:$16 sps:$4 sm:$0xff]   ;;  %v3199_v42 = vld [vmem:[#allocation5 + $0x140] ss:$16 sps:$4 sm:$0xff]   ;;  %v3248_v21 = vld [vmem:[#allocation5 + $0x4c] ss:$16 sps:$4 sm:$0xff]  }
  0x61   :  { %v3197_v41 = vld [vmem:[#allocation5 + $0x344] ss:$16 sps:$4 sm:$0xff]   ;;  %v3200_v43 = vld [vmem:[#allocation5 + $0x340] ss:$16 sps:$4 sm:$0xff]  }
  0x62   :  { %1676 = vmatpush1.bf16.msra.mxu1 %v3169_v22  ;;  %v3201_v44 = vld [vmem:[#allocation5 + $0x164] ss:$16 sps:$4 sm:$0xff]   ;;  %v3205_v47 = vld [vmem:[#allocation5 + $0x160] ss:$16 sps:$4 sm:$0xff]  }
  0x63   :  { %1719 = vmatpush1.bf16.msra.mxu0 %v3170_v23  ;;  %1677 = vmatprep.subr.bf16.mxu1 %v3171_v24  ;;  %v3203_v45 = vld [vmem:[#allocation5 + $0x364] ss:$16 sps:$4 sm:$0xff]   ;;  %v3206_v48 = vld [vmem:[#allocation5 + $0x360] ss:$16 sps:$4 sm:$0xff]   ;;  %v3246_v23 = vld [vmem:[#allocation5 + $0x48] ss:$16 sps:$4 sm:$0xff]  }
  0x64   :  { %1720 = vmatprep.subr.bf16.mxu0 %v3173_v25  ;;  %v3207_v53 = vld [vmem:[#allocation5 + $0x184] ss:$16 sps:$4 sm:$0xff]   ;;  %v3211_v56 = vld [vmem:[#allocation5 + $0x180] ss:$16 sps:$4 sm:$0xff]   ;;  %v3254_v25 = vld [vmem:[#allocation5 + $0x6c] ss:$16 sps:$4 sm:$0xff]  }
  0x65   :  { %v3209_v54 = vld [vmem:[#allocation5 + $0x384] ss:$16 sps:$4 sm:$0xff]   ;;  %v3212_v57 = vld [vmem:[#allocation5 + $0x380] ss:$16 sps:$4 sm:$0xff]  }
  0x66   :  { %1678 = vmatpush1.bf16.msra.mxu1 %v3175_v26  ;;  %v3213_v58 = vld [vmem:[#allocation5 + $0x1a4] ss:$16 sps:$4 sm:$0xff]   ;;  %v3217_v60 = vld [vmem:[#allocation5 + $0x1a0] ss:$16 sps:$4 sm:$0xff]  }
  0x67   :  { %1721 = vmatpush1.bf16.msra.mxu0 %v3176_v27  ;;  %1679 = vmatprep.subr.bf16.mxu1 %v3177_v28  ;;  %v3215_v59 = vld [vmem:[#allocation5 + $0x3a4] ss:$16 sps:$4 sm:$0xff]   ;;  %v3218_v61 = vld [vmem:[#allocation5 + $0x3a0] ss:$16 sps:$4 sm:$0xff]   ;;  %v3252_v27 = vld [vmem:[#allocation5 + $0x68] ss:$16 sps:$4 sm:$0xff]  }
  0x68   :  { %1722 = vmatprep.subr.bf16.mxu0 %v3179_v29  ;;  %v3219_v62 = vld [vmem:[#allocation5 + $0x1c4] ss:$16 sps:$4 sm:$0xff]   ;;  %v3223_v0 = vld [vmem:[#allocation5 + $0x1c0] ss:$16 sps:$4 sm:$0xff]   ;;  %v3260_v29 = vld [vmem:[#allocation5 + $0x8c] ss:$16 sps:$4 sm:$0xff]  }
  0x69   :  { %v3221_v63 = vld [vmem:[#allocation5 + $0x3c4] ss:$16 sps:$4 sm:$0xff]   ;;  %v3224_v1 = vld [vmem:[#allocation5 + $0x3c0] ss:$16 sps:$4 sm:$0xff]  }
  0x6a   :  { %1680 = vmatpush1.bf16.msra.mxu1 %v3181_v30  ;;  %v3225_v2 = vld [vmem:[#allocation5 + $0x1e4] ss:$16 sps:$4 sm:$0xff]   ;;  %v3229_v4 = vld [vmem:[#allocation5 + $0x1e0] ss:$16 sps:$4 sm:$0xff]  }
  0x6b   :  { %1723 = vmatpush1.bf16.msra.mxu0 %v3182_v31  ;;  %1681 = vmatprep.subr.bf16.mxu1 %v3183_v32  ;;  %v3227_v3 = vld [vmem:[#allocation5 + $0x3e4] ss:$16 sps:$4 sm:$0xff]   ;;  %v3230_v5 = vld [vmem:[#allocation5 + $0x3e0] ss:$16 sps:$4 sm:$0xff]   ;;  %v3258_v31 = vld [vmem:[#allocation5 + $0x88] ss:$16 sps:$4 sm:$0xff]  }
  0x6c   :  { %1724 = vmatprep.subr.bf16.mxu0 %v3185_v33  ;;  %v83_v6 = vld [vmem:[#allocation2] sm:$0xff]  ;;  %v85_v9 = vld [vmem:[#allocation2 + $0x10] sm:$0xff]  ;;  %v3266_v33 = vld [vmem:[#allocation5 + $0xac] ss:$16 sps:$4 sm:$0xff]  }
  0x6d   :  { %v91_v7 = vld [vmem:[#allocation2 + $0x40] sm:$0xff]  ;;  %v93_v10 = vld [vmem:[#allocation2 + $0x50] sm:$0xff] }
  0x6e   :  { %1682 = vmatpush1.bf16.msra.mxu1 %v3187_v34  ;;  %v3233_v8 = vld [vmem:[#allocation5 + $0x404] ss:$16 sps:$4 sm:$0xff]   ;;  %v3869_v12 = vpack.c.bf16 %v91_v7, %v83_v6  ;;  %v3231_v13 = vld [vmem:[#allocation5 + $0x400] ss:$16 sps:$4 sm:$0xff]   ;;  %v3871_v15 = vpack.c.bf16 %v93_v10, %v85_v9  ;;  %v3312_v7 = vld [vmem:[#allocation5 + $0x1a8] ss:$16 sps:$4 sm:$0xff]  }
  0x6f   :  { %1725 = vmatpush1.bf16.msra.mxu0 %v3188_v35  ;;  %1683 = vmatprep.subr.bf16.mxu1 %v3189_v36  ;;  %v3239_v16 = vld [vmem:[#allocation5 + $0x424] ss:$16 sps:$4 sm:$0xff]   ;;  %v3237_v18 = vld [vmem:[#allocation5 + $0x420] ss:$16 sps:$4 sm:$0xff]   ;;  %v3264_v35 = vld [vmem:[#allocation5 + $0xa8] ss:$16 sps:$4 sm:$0xff]  }
  0x70   :  { %1726 = vmatprep.subr.bf16.mxu0 %v3191_v37  ;;  %v3245_v20 = vld [vmem:[#allocation5 + $0x444] ss:$16 sps:$4 sm:$0xff]   ;;  %v3243_v22 = vld [vmem:[#allocation5 + $0x440] ss:$16 sps:$4 sm:$0xff]   ;;  %v3272_v37 = vld [vmem:[#allocation5 + $0xcc] ss:$16 sps:$4 sm:$0xff]  }
  0x71   :  { %v3251_v24 = vld [vmem:[#allocation5 + $0x464] ss:$16 sps:$4 sm:$0xff]   ;;  %v3249_v26 = vld [vmem:[#allocation5 + $0x460] ss:$16 sps:$4 sm:$0xff]   ;;  %v3320_v9 = vld [vmem:[#allocation5 + $0x1cc] ss:$16 sps:$4 sm:$0xff]  }
  0x72   :  { %1684 = vmatpush1.bf16.msra.mxu1 %v3193_v38  ;;  %v3257_v28 = vld [vmem:[#allocation5 + $0x484] ss:$16 sps:$4 sm:$0xff]   ;;  %v3255_v30 = vld [vmem:[#allocation5 + $0x480] ss:$16 sps:$4 sm:$0xff]  }
  0x73   :  { %1727 = vmatpush1.bf16.msra.mxu0 %v3194_v39  ;;  %1685 = vmatprep.subr.bf16.mxu1 %v3195_v40  ;;  %v3263_v32 = vld [vmem:[#allocation5 + $0x4a4] ss:$16 sps:$4 sm:$0xff]   ;;  %v3261_v34 = vld [vmem:[#allocation5 + $0x4a0] ss:$16 sps:$4 sm:$0xff]   ;;  %v3270_v39 = vld [vmem:[#allocation5 + $0xc8] ss:$16 sps:$4 sm:$0xff]  }
  0x74   :  { %1728 = vmatprep.subr.bf16.mxu0 %v3197_v41  ;;  %v3269_v36 = vld [vmem:[#allocation5 + $0x4c4] ss:$16 sps:$4 sm:$0xff]   ;;  %v3267_v38 = vld [vmem:[#allocation5 + $0x4c0] ss:$16 sps:$4 sm:$0xff]   ;;  %v88_v40 = vld [vmem:[#allocation2 + $0x28] sm:$0xff] }
  0x75   :  { %v96_v41 = vld [vmem:[#allocation2 + $0x68] sm:$0xff]  ;;  %v3279_v49 = vld [vmem:[#allocation5 + $0x500] ss:$16 sps:$4 sm:$0xff]   ;;  %v3287_v51 = vld [vmem:[#allocation5 + $0x524] ss:$16 sps:$4 sm:$0xff]  }
  0x76   :  { %1686 = vmatpush1.bf16.msra.mxu1 %v3199_v42  ;;  %v3275_v42 = vld [vmem:[#allocation5 + $0x4e4] ss:$16 sps:$4 sm:$0xff]   ;;  %v3309_v6 = vld [vmem:[#allocation5 + $0x5a0] ss:$16 sps:$4 sm:$0xff]  }
  0x77   :  { %1729 = vmatpush1.bf16.msra.mxu0 %v3200_v43  ;;  %1687 = vmatprep.subr.bf16.mxu1 %v3201_v44  ;;  %v3278_v43 = vld [vmem:[#allocation5 + $0xec] ss:$16 sps:$4 sm:$0xff]   ;;  %v3876_v44 = vpack.c.bf16 %v96_v41, %v88_v40  ;;  %v3315_v10 = vld [vmem:[#allocation5 + $0x5c0] ss:$16 sps:$4 sm:$0xff]  }
  0x78   :  { %1730 = vmatprep.subr.bf16.mxu0 %v3203_v45  ;;  %v3273_v45 = vld [vmem:[#allocation5 + $0x4e0] ss:$16 sps:$4 sm:$0xff]   ;;  %v3356_v40 = vld [vmem:[#allocation5 + $0x28c] ss:$16 sps:$4 sm:$0xff]  }
  0x79   :  { %v3351_v41 = vld [vmem:[#allocation5 + $0x680] ss:$16 sps:$4 sm:$0xff]  }
  0x7a   :  { %1688 = vmatpush1.bf16.msra.mxu1 %v3205_v47  ;;  %v3281_v47 = vld [vmem:[#allocation5 + $0x504] ss:$16 sps:$4 sm:$0xff]  }
  0x7b   :  { %1731 = vmatpush1.bf16.msra.mxu0 %v3206_v48  ;;  %1689 = vmatprep.subr.bf16.mxu1 %v3207_v53  ;;  %v3284_v48 = vld [vmem:[#allocation5 + $0x10c] ss:$16 sps:$4 sm:$0xff]   ;;  %v3285_v53 = vld [vmem:[#allocation5 + $0x520] ss:$16 sps:$4 sm:$0xff]  }
  0x7c   :  { %1732 = vmatprep.subr.bf16.mxu0 %v3209_v54  ;;  %v3288_v54 = vld [vmem:[#allocation5 + $0x128] ss:$16 sps:$4 sm:$0xff]  }
  0x7e   :  { %1690 = vmatpush1.bf16.msra.mxu1 %v3211_v56  ;;  %v3293_v56 = vld [vmem:[#allocation5 + $0x544] ss:$16 sps:$4 sm:$0xff]  }
  0x7f   :  { %1733 = vmatpush1.bf16.msra.mxu0 %v3212_v57  ;;  %1691 = vmatprep.subr.bf16.mxu1 %v3213_v58  ;;  %v3296_v57 = vld [vmem:[#allocation5 + $0x14c] ss:$16 sps:$4 sm:$0xff]   ;;  %v3291_v58 = vld [vmem:[#allocation5 + $0x540] ss:$16 sps:$4 sm:$0xff]  }
  0x80   :  { %1734 = vmatprep.subr.bf16.mxu0 %v3215_v59  ;;  %v3294_v59 = vld [vmem:[#allocation5 + $0x148] ss:$16 sps:$4 sm:$0xff]  }
  0x82   :  { %1692 = vmatpush1.bf16.msra.mxu1 %v3217_v60  ;;  %v3299_v60 = vld [vmem:[#allocation5 + $0x564] ss:$16 sps:$4 sm:$0xff]  }
  0x83   :  { %1735 = vmatpush1.bf16.msra.mxu0 %v3218_v61  ;;  %1693 = vmatprep.subr.bf16.mxu1 %v3219_v62  ;;  %v3302_v61 = vld [vmem:[#allocation5 + $0x16c] ss:$16 sps:$4 sm:$0xff]   ;;  %v3297_v62 = vld [vmem:[#allocation5 + $0x560] ss:$16 sps:$4 sm:$0xff]  }
  0x84   :  { %1736 = vmatprep.subr.bf16.mxu0 %v3221_v63  ;;  %v3300_v63 = vld [vmem:[#allocation5 + $0x168] ss:$16 sps:$4 sm:$0xff]  }
  0x86   :  { %1694 = vmatpush1.bf16.msra.mxu1 %v3223_v0  ;;  %v3305_v0 = vld [vmem:[#allocation5 + $0x584] ss:$16 sps:$4 sm:$0xff]  }
  0x87   :  { %1737 = vmatpush1.bf16.msra.mxu0 %v3224_v1  ;;  %1695 = vmatprep.subr.bf16.mxu1 %v3225_v2  ;;  %v3308_v1 = vld [vmem:[#allocation5 + $0x18c] ss:$16 sps:$4 sm:$0xff]   ;;  %v3303_v2 = vld [vmem:[#allocation5 + $0x580] ss:$16 sps:$4 sm:$0xff]  }
  0x88   :  { %1738 = vmatprep.subr.bf16.mxu0 %v3227_v3  ;;  %v3306_v3 = vld [vmem:[#allocation5 + $0x188] ss:$16 sps:$4 sm:$0xff]  }
  0x8a   :  { %1696 = vmatpush1.bf16.msra.mxu1 %v3229_v4  ;;  %v3311_v4 = vld [vmem:[#allocation5 + $0x5a4] ss:$16 sps:$4 sm:$0xff]  }
  0x8b   :  { %1739 = vmatpush1.bf16.msra.mxu0 %v3230_v5  ;;  %1837 = vmatprep.subr.bf16.mxu1 %v3236_v11  ;;  %v3314_v5 = vld [vmem:[#allocation5 + $0x1ac] ss:$16 sps:$4 sm:$0xff]   ;;  %v3318_v11 = vld [vmem:[#allocation5 + $0x1c8] ss:$16 sps:$4 sm:$0xff]  }
  0x8c   :  { %1751 = vmatprep.subr.bf16.mxu0 %v3233_v8  ;;  %v3317_v8 = vld [vmem:[#allocation5 + $0x5c4] ss:$16 sps:$4 sm:$0xff]  }
  0x8d   :  { %1698 = vmatmul.mubr.bf16.vlgmr.msra.gmra.mrb[0].mxu1 %v3869_v12 }
  0x8e   :  { %1741 = vmatmul.mubr.bf16.vlgmr.msra.gmra.mrb[0].mxu0 %v3871_v15  ;;  %1838 = vmatpush1.bf16.msra.mxu1 %v3234_v14  ;;  %v3326_v14 = vld [vmem:[#allocation5 + $0x1ec] ss:$16 sps:$4 sm:$0xff]  }
  0x8f   :  { %1752 = vmatpush1.bf16.msra.mxu0 %v3231_v13  ;;  %1839 = vmatprep.subr.bf16.mxu1 %v3242_v17  ;;  %v3323_v13 = vld [vmem:[#allocation5 + $0x5e4] ss:$16 sps:$4 sm:$0xff]   ;;  %v3324_v17 = vld [vmem:[#allocation5 + $0x1e8] ss:$16 sps:$4 sm:$0xff]  }
  0x90   :  { %1753 = vmatprep.subr.bf16.mxu0 %v3239_v16  ;;  %1869 = vmatprep.mubr.bf16.mxu1 %v3863_v50  ;;  %v3282_v50 = vld [vmem:[#allocation5 + $0x108] ss:$16 sps:$4 sm:$0xff]   ;;  %v3321_v16 = vld [vmem:[#allocation5 + $0x5e0] ss:$16 sps:$4 sm:$0xff]  }
  0x91   :  { %1783 = vmatprep.mubr.bf16.mxu0 %v3876_v44 }
  0x92   :  { %1840 = vmatpush1.bf16.msra.mxu1 %v3240_v19  ;;  %v87_v19 = vld [vmem:[#allocation2 + $0x20] sm:$0xff] }
  0x93   :  { %1754 = vmatpush1.bf16.msra.mxu0 %v3237_v18  ;;  %1841 = vmatprep.subr.bf16.mxu1 %v3248_v21  ;;  %v3329_v18 = vld [vmem:[#allocation5 + $0x604] ss:$16 sps:$4 sm:$0xff]   ;;  %v3332_v21 = vld [vmem:[#allocation5 + $0x20c] ss:$16 sps:$4 sm:$0xff]  }
  0x94   :  { %1755 = vmatprep.subr.bf16.mxu0 %v3245_v20  ;;  %v95_v20 = vld [vmem:[#allocation2 + $0x60] sm:$0xff] }
  0x96   :  { %1842 = vmatpush1.bf16.msra.mxu1 %v3246_v23  ;;  %v3330_v23 = vld [vmem:[#allocation5 + $0x208] ss:$16 sps:$4 sm:$0xff]  }
  0x97   :  { %1756 = vmatpush1.bf16.msra.mxu0 %v3243_v22  ;;  %1843 = vmatprep.subr.bf16.mxu1 %v3254_v25  ;;  %v3327_v22 = vld [vmem:[#allocation5 + $0x600] ss:$16 sps:$4 sm:$0xff]   ;;  %v3335_v25 = vld [vmem:[#allocation5 + $0x624] ss:$16 sps:$4 sm:$0xff]  }
  0x98   :  { %1757 = vmatprep.subr.bf16.mxu0 %v3251_v24  ;;  %v3879_v24 = vpack.c.bf16 %v95_v20, %v87_v19  ;;  %v3416_v19 = vld [vmem:[#allocation5 + $0x3cc] ss:$16 sps:$4 sm:$0xff]   ;;  %v3411_v20 = vld [vmem:[#allocation5 + $0x7c0] ss:$16 sps:$4 sm:$0xff]  }
  0x9a   :  { %1844 = vmatpush1.bf16.msra.mxu1 %v3252_v27  ;;  %v3333_v27 = vld [vmem:[#allocation5 + $0x620] ss:$16 sps:$4 sm:$0xff]  }
  0x9b   :  { %1758 = vmatpush1.bf16.msra.mxu0 %v3249_v26  ;;  %1845 = vmatprep.subr.bf16.mxu1 %v3260_v29  ;;  %v3338_v26 = vld [vmem:[#allocation5 + $0x22c] ss:$16 sps:$4 sm:$0xff]   ;;  %v3341_v29 = vld [vmem:[#allocation5 + $0x644] ss:$16 sps:$4 sm:$0xff]  }
  0x9c   :  { %1759 = vmatprep.subr.bf16.mxu0 %v3257_v28  ;;  %v3336_v28 = vld [vmem:[#allocation5 + $0x228] ss:$16 sps:$4 sm:$0xff]  }
  0x9e   :  { %1846 = vmatpush1.bf16.msra.mxu1 %v3258_v31  ;;  %v98_v31 = vld [vmem:[#allocation2 + $0x78] sm:$0xff] }
  0x9f   :  { %1760 = vmatpush1.bf16.msra.mxu0 %v3255_v30  ;;  %1847 = vmatprep.subr.bf16.mxu1 %v3266_v33  ;;  %v90_v30 = vld [vmem:[#allocation2 + $0x38] sm:$0xff] }
  0xa0   :  { %1761 = vmatprep.subr.bf16.mxu0 %v3263_v32  ;;  %v3344_v32 = vld [vmem:[#allocation5 + $0x24c] ss:$16 sps:$4 sm:$0xff]   ;;  %v3883_v33 = vpack.c.bf16 %v98_v31, %v90_v30  ;;  %v3423_v30 = vld [vmem:[#allocation5 + $0x408] ss:$16 sps:$4 sm:$0xff]  }
  0xa2   :  { %1848 = vmatpush1.bf16.msra.mxu1 %v3264_v35  ;;  %v3342_v35 = vld [vmem:[#allocation5 + $0x248] ss:$16 sps:$4 sm:$0xff]  }
  0xa3   :  { %1762 = vmatpush1.bf16.msra.mxu0 %v3261_v34  ;;  %1849 = vmatprep.subr.bf16.mxu1 %v3272_v37  ;;  %v3339_v34 = vld [vmem:[#allocation5 + $0x640] ss:$16 sps:$4 sm:$0xff]  }
  0xa4   :  { %1763 = vmatprep.subr.bf16.mxu0 %v3269_v36  ;;  %v3350_v36 = vld [vmem:[#allocation5 + $0x26c] ss:$16 sps:$4 sm:$0xff]   ;;  %v3345_v37 = vld [vmem:[#allocation5 + $0x660] ss:$16 sps:$4 sm:$0xff]  }
  0xa6   :  { %1850 = vmatpush1.bf16.msra.mxu1 %v3270_v39  ;;  %v3353_v39 = vld [vmem:[#allocation5 + $0x684] ss:$16 sps:$4 sm:$0xff]  }
  0xa7   :  { %1764 = vmatpush1.bf16.msra.mxu0 %v3267_v38  ;;  %1851 = vmatprep.subr.bf16.mxu1 %v3278_v43  ;;  %v3348_v38 = vld [vmem:[#allocation5 + $0x268] ss:$16 sps:$4 sm:$0xff]   ;;  %v3362_v43 = vld [vmem:[#allocation5 + $0x2ac] ss:$16 sps:$4 sm:$0xff]  }
  0xa8   :  { %1765 = vmatprep.subr.bf16.mxu0 %v3275_v42  ;;  %v3359_v42 = vld [vmem:[#allocation5 + $0x6a4] ss:$16 sps:$4 sm:$0xff]  }
  0xaa   :  { %1852 = vmatpush1.bf16.msra.mxu1 %v3276_v46  ;;  %v3360_v46 = vld [vmem:[#allocation5 + $0x2a8] ss:$16 sps:$4 sm:$0xff]  }
  0xab   :  { %1766 = vmatpush1.bf16.msra.mxu0 %v3273_v45  ;;  %1853 = vmatprep.subr.bf16.mxu1 %v3284_v48  ;;  %v3357_v45 = vld [vmem:[#allocation5 + $0x6a0] ss:$16 sps:$4 sm:$0xff]   ;;  %v3368_v48 = vld [vmem:[#allocation5 + $0x2cc] ss:$16 sps:$4 sm:$0xff]  }
  0xac   :  { %1767 = vmatprep.subr.bf16.mxu0 %v3281_v47  ;;  %v3365_v47 = vld [vmem:[#allocation5 + $0x6c4] ss:$16 sps:$4 sm:$0xff]  }
  0xae   :  { %1854 = vmatpush1.bf16.msra.mxu1 %v3282_v50  ;;  %v3366_v50 = vld [vmem:[#allocation5 + $0x2c8] ss:$16 sps:$4 sm:$0xff]  }
  0xaf   :  { %1768 = vmatpush1.bf16.msra.mxu0 %v3279_v49  ;;  %1855 = vmatprep.subr.bf16.mxu1 %v3290_v52  ;;  %v3363_v49 = vld [vmem:[#allocation5 + $0x6c0] ss:$16 sps:$4 sm:$0xff]   ;;  %v3374_v52 = vld [vmem:[#allocation5 + $0x2ec] ss:$16 sps:$4 sm:$0xff]  }
  0xb0   :  { %1769 = vmatprep.subr.bf16.mxu0 %v3287_v51  ;;  %v3371_v51 = vld [vmem:[#allocation5 + $0x6e4] ss:$16 sps:$4 sm:$0xff]  }
  0xb2   :  { %1856 = vmatpush1.bf16.msra.mxu1 %v3288_v54  ;;  %v3372_v54 = vld [vmem:[#allocation5 + $0x2e8] ss:$16 sps:$4 sm:$0xff]  }
  0xb3   :  { %1770 = vmatpush1.bf16.msra.mxu0 %v3285_v53  ;;  %1857 = vmatprep.subr.bf16.mxu1 %v3296_v57  ;;  %v3369_v53 = vld [vmem:[#allocation5 + $0x6e0] ss:$16 sps:$4 sm:$0xff]   ;;  %v3380_v57 = vld [vmem:[#allocation5 + $0x30c] ss:$16 sps:$4 sm:$0xff]  }
  0xb4   :  { %1771 = vmatprep.subr.bf16.mxu0 %v3293_v56  ;;  %v3377_v56 = vld [vmem:[#allocation5 + $0x704] ss:$16 sps:$4 sm:$0xff]  }
  0xb6   :  { %1858 = vmatpush1.bf16.msra.mxu1 %v3294_v59  ;;  %v3378_v59 = vld [vmem:[#allocation5 + $0x308] ss:$16 sps:$4 sm:$0xff]  }
  0xb7   :  { %1772 = vmatpush1.bf16.msra.mxu0 %v3291_v58  ;;  %1859 = vmatprep.subr.bf16.mxu1 %v3302_v61  ;;  %v3375_v58 = vld [vmem:[#allocation5 + $0x700] ss:$16 sps:$4 sm:$0xff]   ;;  %v3386_v61 = vld [vmem:[#allocation5 + $0x32c] ss:$16 sps:$4 sm:$0xff]  }
  0xb8   :  { %1773 = vmatprep.subr.bf16.mxu0 %v3299_v60  ;;  %v3383_v60 = vld [vmem:[#allocation5 + $0x724] ss:$16 sps:$4 sm:$0xff]  }
  0xba   :  { %1860 = vmatpush1.bf16.msra.mxu1 %v3300_v63  ;;  %v3384_v63 = vld [vmem:[#allocation5 + $0x328] ss:$16 sps:$4 sm:$0xff]  }
  0xbb   :  { %1774 = vmatpush1.bf16.msra.mxu0 %v3297_v62  ;;  %1861 = vmatprep.subr.bf16.mxu1 %v3308_v1  ;;  %v3381_v62 = vld [vmem:[#allocation5 + $0x720] ss:$16 sps:$4 sm:$0xff]   ;;  %v3392_v1 = vld [vmem:[#allocation5 + $0x34c] ss:$16 sps:$4 sm:$0xff]  }
  0xbc   :  { %1775 = vmatprep.subr.bf16.mxu0 %v3305_v0  ;;  %v3389_v0 = vld [vmem:[#allocation5 + $0x744] ss:$16 sps:$4 sm:$0xff]  }
  0xbe   :  { %1862 = vmatpush1.bf16.msra.mxu1 %v3306_v3  ;;  %v3390_v3 = vld [vmem:[#allocation5 + $0x348] ss:$16 sps:$4 sm:$0xff]  }
  0xbf   :  { %1776 = vmatpush1.bf16.msra.mxu0 %v3303_v2  ;;  %1863 = vmatprep.subr.bf16.mxu1 %v3314_v5  ;;  %v3387_v2 = vld [vmem:[#allocation5 + $0x740] ss:$16 sps:$4 sm:$0xff]   ;;  %v3398_v5 = vld [vmem:[#allocation5 + $0x36c] ss:$16 sps:$4 sm:$0xff]  }
  0xc0   :  { %1777 = vmatprep.subr.bf16.mxu0 %v3311_v4  ;;  %v3395_v4 = vld [vmem:[#allocation5 + $0x764] ss:$16 sps:$4 sm:$0xff]  }
  0xc2   :  { %1864 = vmatpush1.bf16.msra.mxu1 %v3312_v7  ;;  %v3396_v7 = vld [vmem:[#allocation5 + $0x368] ss:$16 sps:$4 sm:$0xff]  }
  0xc3   :  { %1778 = vmatpush1.bf16.msra.mxu0 %v3309_v6  ;;  %1865 = vmatprep.subr.bf16.mxu1 %v3320_v9  ;;  %v3393_v6 = vld [vmem:[#allocation5 + $0x760] ss:$16 sps:$4 sm:$0xff]   ;;  %v3404_v9 = vld [vmem:[#allocation5 + $0x38c] ss:$16 sps:$4 sm:$0xff]  }
  0xc4   :  { %1779 = vmatprep.subr.bf16.mxu0 %v3317_v8  ;;  %v3401_v8 = vld [vmem:[#allocation5 + $0x784] ss:$16 sps:$4 sm:$0xff]  }
  0xc6   :  { %1866 = vmatpush1.bf16.msra.mxu1 %v3318_v11  ;;  %v3402_v11 = vld [vmem:[#allocation5 + $0x388] ss:$16 sps:$4 sm:$0xff]  }
  0xc7   :  { %1780 = vmatpush1.bf16.msra.mxu0 %v3315_v10  ;;  %1867 = vmatprep.subr.bf16.mxu1 %v3326_v14  ;;  %v3399_v10 = vld [vmem:[#allocation5 + $0x780] ss:$16 sps:$4 sm:$0xff]   ;;  %v3410_v14 = vld [vmem:[#allocation5 + $0x3ac] ss:$16 sps:$4 sm:$0xff]  }
  0xc8   :  { %1781 = vmatprep.subr.bf16.mxu0 %v3323_v13  ;;  %v3407_v13 = vld [vmem:[#allocation5 + $0x7a4] ss:$16 sps:$4 sm:$0xff]  }
  0xca   :  { %1868 = vmatpush1.bf16.msra.mxu1 %v3324_v17  ;;  %v3408_v17 = vld [vmem:[#allocation5 + $0x3a8] ss:$16 sps:$4 sm:$0xff]  }
  0xcb   :  { %1782 = vmatpush1.bf16.msra.mxu0 %v3321_v16  ;;  %1880 = vmatprep.subr.bf16.mxu1 %v3332_v21  ;;  %v3405_v16 = vld [vmem:[#allocation5 + $0x7a0] ss:$16 sps:$4 sm:$0xff]   ;;  %v3414_v21 = vld [vmem:[#allocation5 + $0x3c8] ss:$16 sps:$4 sm:$0xff]  }
  0xcc   :  { %1794 = vmatprep.subr.bf16.mxu0 %v3329_v18  ;;  %v3413_v18 = vld [vmem:[#allocation5 + $0x7c4] ss:$16 sps:$4 sm:$0xff]  }
  0xcd   :  { %1870 = vmatmul.mubr.bf16.vlgmr.msra.gmra.mrb[4].mxu1 %v3869_v12  ;;  %v3347_v12 = vld [vmem:[#allocation5 + $0x664] ss:$16 sps:$4 sm:$0xff]  }
  0xce   :  { %1784 = vmatmul.mubr.bf16.vlgmr.msra.gmra.mrb[0].mxu0 %v3879_v24  ;;  %1881 = vmatpush1.bf16.msra.mxu1 %v3330_v23  ;;  %v3422_v23 = vld [vmem:[#allocation5 + $0x3ec] ss:$16 sps:$4 sm:$0xff]  }
  0xcf   :  { %1795 = vmatpush1.bf16.msra.mxu0 %v3327_v22  ;;  %1882 = vmatprep.subr.bf16.mxu1 %v3338_v26  ;;  %v3419_v22 = vld [vmem:[#allocation5 + $0x7e4] ss:$16 sps:$4 sm:$0xff]   ;;  %v3420_v26 = vld [vmem:[#allocation5 + $0x3e8] ss:$16 sps:$4 sm:$0xff]  }
  0xd0   :  { %1796 = vmatprep.subr.bf16.mxu0 %v3335_v25  ;;  %1912 = vmatprep.mubr.bf16.mxu1 %v3865_v55  ;;  %v3354_v55 = vld [vmem:[#allocation5 + $0x288] ss:$16 sps:$4 sm:$0xff]   ;;  %v3417_v25 = vld [vmem:[#allocation5 + $0x7e0] ss:$16 sps:$4 sm:$0xff]  }
  0xd1   :  { %1826 = vmatprep.mubr.bf16.mxu0 %v3883_v33 }
  0xd2   :  { %1883 = vmatpush1.bf16.msra.mxu1 %v3336_v28  ;;  %v97_v28 = vld [vmem:[#allocation2 + $0x70] sm:$0xff] }
  0xd3   :  { %1797 = vmatpush1.bf16.msra.mxu0 %v3333_v27  ;;  %1884 = vmatprep.subr.bf16.mxu1 %v3344_v32  ;;  %v89_v27 = vld [vmem:[#allocation2 + $0x30] sm:$0xff]  ;;  %v3428_v32 = vld [vmem:[#allocation5 + $0x42c] ss:$16 sps:$4 sm:$0xff]  }
  0xd4   :  { %1798 = vmatprep.subr.bf16.mxu0 %v3341_v29  ;;  %v3425_v29 = vld [vmem:[#allocation5 + $0x40c] ss:$16 sps:$4 sm:$0xff]   ;;  %v3887_v31 = vpack.c.bf16 %v97_v28, %v89_v27  ;;  %v3468_v27 = vld [vmem:[#allocation5 + $0x5e8] ss:$16 sps:$4 sm:$0xff]  }
  0xd5   :  { %v3473_v28 = vld [vmem:[#allocation5 + $0x60c] ss:$16 sps:$4 sm:$0xff]  }
  0xd6   :  { %1885 = vmatpush1.bf16.msra.mxu1 %v3342_v35  ;;  %v3521_v35 = vld [vmem:[#allocation7 + $0x4] ss:$8 sps:$4 sm:$0xff]  }
  0xd7   :  { %1799 = vmatpush1.bf16.msra.mxu0 %v3339_v34  ;;  %1886 = vmatprep.subr.bf16.mxu1 %v3350_v36  ;;  %v3519_v34 = vld [vmem:[#allocation7] ss:$8 sps:$4 sm:$0xff]   ;;  %v3524_v36 = vld [vmem:[#allocation7 + $0x14] ss:$8 sps:$4 sm:$0xff]  }
  0xd8   :  { %1800 = vmatprep.subr.bf16.mxu0 %v3347_v12  ;;  %v3426_v12 = vld [vmem:[#allocation5 + $0x428] ss:$16 sps:$4 sm:$0xff]  }
  0xda   :  { %1887 = vmatpush1.bf16.msra.mxu1 %v3348_v38  ;;  %v3522_v38 = vld [vmem:[#allocation7 + $0x10] ss:$8 sps:$4 sm:$0xff]  }
  0xdb   :  { %1801 = vmatpush1.bf16.msra.mxu0 %v3345_v37  ;;  %1888 = vmatprep.subr.bf16.mxu1 %v3356_v40  ;;  %v3431_v37 = vld [vmem:[#allocation5 + $0x44c] ss:$16 sps:$4 sm:$0xff]   ;;  %v3429_v40 = vld [vmem:[#allocation5 + $0x448] ss:$16 sps:$4 sm:$0xff]  }
  0xdc   :  { %1802 = vmatprep.subr.bf16.mxu0 %v3353_v39  ;;  %v3527_v39 = vld [vmem:[#allocation7 + $0x24] ss:$8 sps:$4 sm:$0xff]  }
  0xde   :  { %1889 = vmatpush1.bf16.msra.mxu1 %v3354_v55  ;;  %v3432_v55 = vld [vmem:[#allocation5 + $0x468] ss:$16 sps:$4 sm:$0xff]  }
  0xdf   :  { %1803 = vmatpush1.bf16.msra.mxu0 %v3351_v41  ;;  %1890 = vmatprep.subr.bf16.mxu1 %v3362_v43  ;;  %v3434_v41 = vld [vmem:[#allocation5 + $0x46c] ss:$16 sps:$4 sm:$0xff]  }
  0xe0   :  { %1804 = vmatprep.subr.bf16.mxu0 %v3359_v42  ;;  %v3437_v42 = vld [vmem:[#allocation5 + $0x48c] ss:$16 sps:$4 sm:$0xff]  }
  0xe1   :  { %v3530_v43 = vld [vmem:[#allocation7 + $0x34] ss:$8 sps:$4 sm:$0xff]  }
  0xe2   :  { %1891 = vmatpush1.bf16.msra.mxu1 %v3360_v46  ;;  %v3435_v46 = vld [vmem:[#allocation5 + $0x488] ss:$16 sps:$4 sm:$0xff]  }
  0xe3   :  { %1805 = vmatpush1.bf16.msra.mxu0 %v3357_v45  ;;  %1892 = vmatprep.subr.bf16.mxu1 %v3368_v48  ;;  %v3533_v45 = vld [vmem:[#allocation7 + $0x44] ss:$8 sps:$4 sm:$0xff]   ;;  %v3531_v48 = vld [vmem:[#allocation7 + $0x40] ss:$8 sps:$4 sm:$0xff]  }
  0xe4   :  { %1806 = vmatprep.subr.bf16.mxu0 %v3365_v47  ;;  %v3440_v47 = vld [vmem:[#allocation5 + $0x4ac] ss:$16 sps:$4 sm:$0xff]  }
  0xe6   :  { %1893 = vmatpush1.bf16.msra.mxu1 %v3366_v50  ;;  %v3438_v50 = vld [vmem:[#allocation5 + $0x4a8] ss:$16 sps:$4 sm:$0xff]  }
  0xe7   :  { %1807 = vmatpush1.bf16.msra.mxu0 %v3363_v49  ;;  %1894 = vmatprep.subr.bf16.mxu1 %v3374_v52  ;;  %v3536_v49 = vld [vmem:[#allocation7 + $0x54] ss:$8 sps:$4 sm:$0xff]   ;;  %v3534_v52 = vld [vmem:[#allocation7 + $0x50] ss:$8 sps:$4 sm:$0xff]  }
  0xe8   :  { %1808 = vmatprep.subr.bf16.mxu0 %v3371_v51  ;;  %v3443_v51 = vld [vmem:[#allocation5 + $0x4cc] ss:$16 sps:$4 sm:$0xff]  }
  0xea   :  { %1895 = vmatpush1.bf16.msra.mxu1 %v3372_v54  ;;  %v3441_v54 = vld [vmem:[#allocation5 + $0x4c8] ss:$16 sps:$4 sm:$0xff]  }
  0xeb   :  { %1809 = vmatpush1.bf16.msra.mxu0 %v3369_v53  ;;  %1896 = vmatprep.subr.bf16.mxu1 %v3380_v57  ;;  %v3539_v53 = vld [vmem:[#allocation7 + $0x64] ss:$8 sps:$4 sm:$0xff]   ;;  %v3537_v57 = vld [vmem:[#allocation7 + $0x60] ss:$8 sps:$4 sm:$0xff]  }
  0xec   :  { %1810 = vmatprep.subr.bf16.mxu0 %v3377_v56  ;;  %v3446_v56 = vld [vmem:[#allocation5 + $0x4ec] ss:$16 sps:$4 sm:$0xff]  }
  0xee   :  { %1897 = vmatpush1.bf16.msra.mxu1 %v3378_v59  ;;  %v3444_v59 = vld [vmem:[#allocation5 + $0x4e8] ss:$16 sps:$4 sm:$0xff]  }
  0xef   :  { %1811 = vmatpush1.bf16.msra.mxu0 %v3375_v58  ;;  %1898 = vmatprep.subr.bf16.mxu1 %v3386_v61  ;;  %v3542_v58 = vld [vmem:[#allocation7 + $0x74] ss:$8 sps:$4 sm:$0xff]   ;;  %v3540_v61 = vld [vmem:[#allocation7 + $0x70] ss:$8 sps:$4 sm:$0xff]  }
  0xf0   :  { %1812 = vmatprep.subr.bf16.mxu0 %v3383_v60  ;;  %v3449_v60 = vld [vmem:[#allocation5 + $0x50c] ss:$16 sps:$4 sm:$0xff]  }
  0xf2   :  { %1899 = vmatpush1.bf16.msra.mxu1 %v3384_v63  ;;  %v3447_v63 = vld [vmem:[#allocation5 + $0x508] ss:$16 sps:$4 sm:$0xff]  }
  0xf3   :  { %1813 = vmatpush1.bf16.msra.mxu0 %v3381_v62  ;;  %1900 = vmatprep.subr.bf16.mxu1 %v3392_v1  ;;  %v3545_v62 = vld [vmem:[#allocation7 + $0x84] ss:$8 sps:$4 sm:$0xff]   ;;  %v3543_v1 = vld [vmem:[#allocation7 + $0x80] ss:$8 sps:$4 sm:$0xff]  }
  0xf4   :  { %1814 = vmatprep.subr.bf16.mxu0 %v3389_v0  ;;  %v3452_v0 = vld [vmem:[#allocation5 + $0x52c] ss:$16 sps:$4 sm:$0xff]  }
  0xf6   :  { %1901 = vmatpush1.bf16.msra.mxu1 %v3390_v3  ;;  %v3450_v3 = vld [vmem:[#allocation5 + $0x528] ss:$16 sps:$4 sm:$0xff]  }
  0xf7   :  { %1815 = vmatpush1.bf16.msra.mxu0 %v3387_v2  ;;  %1902 = vmatprep.subr.bf16.mxu1 %v3398_v5  ;;  %v3548_v2 = vld [vmem:[#allocation7 + $0x94] ss:$8 sps:$4 sm:$0xff]   ;;  %v3546_v5 = vld [vmem:[#allocation7 + $0x90] ss:$8 sps:$4 sm:$0xff]  }
  0xf8   :  { %1816 = vmatprep.subr.bf16.mxu0 %v3395_v4  ;;  %v3455_v4 = vld [vmem:[#allocation5 + $0x54c] ss:$16 sps:$4 sm:$0xff]  }
  0xfa   :  { %1903 = vmatpush1.bf16.msra.mxu1 %v3396_v7  ;;  %v3453_v7 = vld [vmem:[#allocation5 + $0x548] ss:$16 sps:$4 sm:$0xff]  }
  0xfb   :  { %1817 = vmatpush1.bf16.msra.mxu0 %v3393_v6  ;;  %1904 = vmatprep.subr.bf16.mxu1 %v3404_v9  ;;  %v3551_v6 = vld [vmem:[#allocation7 + $0xa4] ss:$8 sps:$4 sm:$0xff]   ;;  %v3549_v9 = vld [vmem:[#allocation7 + $0xa0] ss:$8 sps:$4 sm:$0xff]  }
  0xfc   :  { %1818 = vmatprep.subr.bf16.mxu0 %v3401_v8  ;;  %v3458_v8 = vld [vmem:[#allocation5 + $0x56c] ss:$16 sps:$4 sm:$0xff]  }
  0xfe   :  { %1905 = vmatpush1.bf16.msra.mxu1 %v3402_v11  ;;  %v3456_v11 = vld [vmem:[#allocation5 + $0x568] ss:$16 sps:$4 sm:$0xff]  }
  0xff   :  { %1819 = vmatpush1.bf16.msra.mxu0 %v3399_v10  ;;  %1906 = vmatprep.subr.bf16.mxu1 %v3410_v14  ;;  %v3554_v10 = vld [vmem:[#allocation7 + $0xb4] ss:$8 sps:$4 sm:$0xff]   ;;  %v3552_v14 = vld [vmem:[#allocation7 + $0xb0] ss:$8 sps:$4 sm:$0xff]  }
 0x100   :  { %1820 = vmatprep.subr.bf16.mxu0 %v3407_v13  ;;  %v3461_v13 = vld [vmem:[#allocation5 + $0x58c] ss:$16 sps:$4 sm:$0xff]  }
 0x102   :  { %1907 = vmatpush1.bf16.msra.mxu1 %v3408_v17  ;;  %v3459_v17 = vld [vmem:[#allocation5 + $0x588] ss:$16 sps:$4 sm:$0xff]  }
 0x103   :  { %1821 = vmatpush1.bf16.msra.mxu0 %v3405_v16  ;;  %1908 = vmatprep.subr.bf16.mxu1 %v3416_v19  ;;  %v3557_v16 = vld [vmem:[#allocation7 + $0xc4] ss:$8 sps:$4 sm:$0xff]   ;;  %v3555_v19 = vld [vmem:[#allocation7 + $0xc0] ss:$8 sps:$4 sm:$0xff]  }
 0x104   :  { %1822 = vmatprep.subr.bf16.mxu0 %v3413_v18  ;;  %v3464_v18 = vld [vmem:[#allocation5 + $0x5ac] ss:$16 sps:$4 sm:$0xff]  }
 0x106   :  { %1909 = vmatpush1.bf16.msra.mxu1 %v3414_v21  ;;  %v3462_v21 = vld [vmem:[#allocation5 + $0x5a8] ss:$16 sps:$4 sm:$0xff]  }
 0x107   :  { %1823 = vmatpush1.bf16.msra.mxu0 %v3411_v20  ;;  %1910 = vmatprep.subr.bf16.mxu1 %v3422_v23  ;;  %v3560_v20 = vld [vmem:[#allocation7 + $0xd4] ss:$8 sps:$4 sm:$0xff]   ;;  %v3558_v23 = vld [vmem:[#allocation7 + $0xd0] ss:$8 sps:$4 sm:$0xff]  }
 0x108   :  { %1824 = vmatprep.subr.bf16.mxu0 %v3419_v22  ;;  %v3467_v22 = vld [vmem:[#allocation5 + $0x5cc] ss:$16 sps:$4 sm:$0xff]  }
 0x10a   :  { %1911 = vmatpush1.bf16.msra.mxu1 %v3420_v26  ;;  %v3470_v26 = vld [vmem:[#allocation5 + $0x5ec] ss:$16 sps:$4 sm:$0xff]  }
 0x10b   :  { %1825 = vmatpush1.bf16.msra.mxu0 %v3417_v25  ;;  %1923 = vmatprep.subr.bf16.mxu1 %v3425_v29  ;;  %v3465_v25 = vld [vmem:[#allocation5 + $0x5c8] ss:$16 sps:$4 sm:$0xff]  }
 0x10c   :  { %2417 = vmatprep.subr.bf16.mxu0 %v3521_v35  ;;  %v3471_v29 = vld [vmem:[#allocation5 + $0x608] ss:$16 sps:$4 sm:$0xff]  }
 0x10d   :  { %1913 = vmatmul.mubr.bf16.vlgmr.msra.gmra.mrb[4].mxu1 %v3871_v15  ;;  %v3525_v15 = vld [vmem:[#allocation7 + $0x20] ss:$8 sps:$4 sm:$0xff]  }
 0x10e   :  { %1827 = vmatmul.mubr.bf16.vlgmr.msra.gmra.mrb[0].mxu0 %v3887_v31  ;;  %1924 = vmatpush1.bf16.msra.mxu1 %v3423_v30  ;;  %v3476_v30 = vld [vmem:[#allocation5 + $0x62c] ss:$16 sps:$4 sm:$0xff]   ;;  %v3477_v35 = vld [vmem:[#allocation5 + $0x648] ss:$16 sps:$4 sm:$0xff]  }
 0x10f   :  { %1955 = vmatprep.mubr.bf16.mxu1 %v3876_v44  ;;  %1925 = vmatprep.subr.bf16.mxu1 %v3428_v32  ;;  %v3528_v44 = vld [vmem:[#allocation7 + $0x30] ss:$8 sps:$4 sm:$0xff]  }
 0x110   :  { %2418 = vmatpush1.bf16.msra.mxu0 %v3519_v34  ;;  %v3474_v32 = vld [vmem:[#allocation5 + $0x628] ss:$16 sps:$4 sm:$0xff]   ;;  %v3479_v34 = vld [vmem:[#allocation5 + $0x64c] ss:$16 sps:$4 sm:$0xff]  }
 0x111   :  { %2419 = vmatprep.subr.bf16.mxu0 %v3524_v36  ;;  %v3480_v36 = vld [vmem:[#allocation5 + $0x668] ss:$16 sps:$4 sm:$0xff]  }
 0x112   :  { %1926 = vmatpush1.bf16.msra.mxu1 %v3426_v12  ;;  %v3482_v12 = vld [vmem:[#allocation5 + $0x66c] ss:$16 sps:$4 sm:$0xff]  }
 0x113   :  { %1927 = vmatprep.subr.bf16.mxu1 %v3431_v37  ;;  %v3485_v37 = vld [vmem:[#allocation5 + $0x68c] ss:$16 sps:$4 sm:$0xff]  }
 0x114   :  { %2420 = vmatpush1.bf16.msra.mxu0 %v3522_v38  ;;  %v3483_v38 = vld [vmem:[#allocation5 + $0x688] ss:$16 sps:$4 sm:$0xff]  }
 0x115   :  { %2421 = vmatprep.subr.bf16.mxu0 %v3527_v39  ;;  %v3488_v39 = vld [vmem:[#allocation5 + $0x6ac] ss:$16 sps:$4 sm:$0xff]  }
 0x116   :  { %1928 = vmatpush1.bf16.msra.mxu1 %v3429_v40  ;;  %v3491_v40 = vld [vmem:[#allocation5 + $0x6cc] ss:$16 sps:$4 sm:$0xff]  }
 0x117   :  { %1929 = vmatprep.subr.bf16.mxu1 %v3434_v41 }
 0x118   :  { %2422 = vmatpush1.bf16.msra.mxu0 %v3525_v15  ;;  %v3563_v15 = vld [vmem:[#allocation7 + $0xe4] ss:$8 sps:$4 sm:$0xff]  }
 0x119   :  { %2423 = vmatprep.subr.bf16.mxu0 %v3530_v43  ;;  %v3561_v43 = vld [vmem:[#allocation7 + $0xe0] ss:$8 sps:$4 sm:$0xff]  }
 0x11a   :  { %1930 = vmatpush1.bf16.msra.mxu1 %v3432_v55 }
 0x11b   :  { %1931 = vmatprep.subr.bf16.mxu1 %v3437_v42  ;;  %v3489_v42 = vld [vmem:[#allocation5 + $0x6c8] ss:$16 sps:$4 sm:$0xff]  }
 0x11c   :  { %2424 = vmatpush1.bf16.msra.mxu0 %v3528_v44 }
 0x11d   :  { %2425 = vmatprep.subr.bf16.mxu0 %v3533_v45  ;;  %v3494_v45 = vld [vmem:[#allocation5 + $0x6ec] ss:$16 sps:$4 sm:$0xff]  }
 0x11e   :  { %1932 = vmatpush1.bf16.msra.mxu1 %v3435_v46  ;;  %v3566_v46 = vld [vmem:[#allocation7 + $0xf4] ss:$8 sps:$4 sm:$0xff]  }
 0x11f   :  { %1933 = vmatprep.subr.bf16.mxu1 %v3440_v47  ;;  %v3492_v47 = vld [vmem:[#allocation5 + $0x6e8] ss:$16 sps:$4 sm:$0xff]  }
 0x120   :  { %2426 = vmatpush1.bf16.msra.mxu0 %v3531_v48  ;;  %v3564_v48 = vld [vmem:[#allocation7 + $0xf0] ss:$8 sps:$4 sm:$0xff]  }
 0x121   :  { %2427 = vmatprep.subr.bf16.mxu0 %v3536_v49  ;;  %v3497_v49 = vld [vmem:[#allocation5 + $0x70c] ss:$16 sps:$4 sm:$0xff]  }
 0x122   :  { %1934 = vmatpush1.bf16.msra.mxu1 %v3438_v50  ;;  %v3495_v50 = vld [vmem:[#allocation5 + $0x708] ss:$16 sps:$4 sm:$0xff]  }
 0x123   :  { %1935 = vmatprep.subr.bf16.mxu1 %v3443_v51  ;;  %v3500_v51 = vld [vmem:[#allocation5 + $0x72c] ss:$16 sps:$4 sm:$0xff]  }
 0x124   :  { %2428 = vmatpush1.bf16.msra.mxu0 %v3534_v52  ;;  %v3569_v52 = vld [vmem:[#allocation7 + $0x104] ss:$8 sps:$4 sm:$0xff]  }
 0x125   :  { %2429 = vmatprep.subr.bf16.mxu0 %v3539_v53  ;;  %v3498_v53 = vld [vmem:[#allocation5 + $0x728] ss:$16 sps:$4 sm:$0xff]  }
 0x126   :  { %1936 = vmatpush1.bf16.msra.mxu1 %v3441_v54  ;;  %v3503_v54 = vld [vmem:[#allocation5 + $0x74c] ss:$16 sps:$4 sm:$0xff]  }
 0x127   :  { %1937 = vmatprep.subr.bf16.mxu1 %v3446_v56  ;;  %v3501_v56 = vld [vmem:[#allocation5 + $0x748] ss:$16 sps:$4 sm:$0xff]  }
 0x128   :  { %2430 = vmatpush1.bf16.msra.mxu0 %v3537_v57  ;;  %v3506_v57 = vld [vmem:[#allocation5 + $0x76c] ss:$16 sps:$4 sm:$0xff]  }
 0x129   :  { %2431 = vmatprep.subr.bf16.mxu0 %v3542_v58  ;;  %v3504_v58 = vld [vmem:[#allocation5 + $0x768] ss:$16 sps:$4 sm:$0xff]  }
 0x12a   :  { %1938 = vmatpush1.bf16.msra.mxu1 %v3444_v59  ;;  %v3509_v59 = vld [vmem:[#allocation5 + $0x78c] ss:$16 sps:$4 sm:$0xff]  }
 0x12b   :  { %1939 = vmatprep.subr.bf16.mxu1 %v3449_v60  ;;  %v3507_v60 = vld [vmem:[#allocation5 + $0x788] ss:$16 sps:$4 sm:$0xff]  }
 0x12c   :  { %2432 = vmatpush1.bf16.msra.mxu0 %v3540_v61  ;;  %v3512_v61 = vld [vmem:[#allocation5 + $0x7ac] ss:$16 sps:$4 sm:$0xff]  }
 0x12d   :  { %2433 = vmatprep.subr.bf16.mxu0 %v3545_v62  ;;  %v3510_v62 = vld [vmem:[#allocation5 + $0x7a8] ss:$16 sps:$4 sm:$0xff]  }
 0x12e   :  { %1940 = vmatpush1.bf16.msra.mxu1 %v3447_v63  ;;  %v3515_v63 = vld [vmem:[#allocation5 + $0x7cc] ss:$16 sps:$4 sm:$0xff]  }
 0x12f   :  { %1941 = vmatprep.subr.bf16.mxu1 %v3452_v0  ;;  %v3513_v0 = vld [vmem:[#allocation5 + $0x7c8] ss:$16 sps:$4 sm:$0xff]  }
 0x130   :  { %2434 = vmatpush1.bf16.msra.mxu0 %v3543_v1  ;;  %v3518_v1 = vld [vmem:[#allocation5 + $0x7ec] ss:$16 sps:$4 sm:$0xff]  }
 0x131   :  { %2435 = vmatprep.subr.bf16.mxu0 %v3548_v2  ;;  %v3516_v2 = vld [vmem:[#allocation5 + $0x7e8] ss:$16 sps:$4 sm:$0xff]  }
 0x132   :  { %1942 = vmatpush1.bf16.msra.mxu1 %v3450_v3  ;;  %v365_v3 = vlaneseq }
 0x133   :  { %1943 = vmatprep.subr.bf16.mxu1 %v3455_v4 }
 0x134   :  { %2436 = vmatpush1.bf16.msra.mxu0 %v3546_v5  ;;  %v3895_v4 = vshrl.u32 %v365_v3, 7  ;;  %v3609_v3 = vld [vmem:[#allocation7 + $0x1e0] ss:$8 sps:$4 sm:$0xff]  }
 0x135   :  { %2437 = vmatprep.subr.bf16.mxu0 %v3551_v6  ;;  %v3901_v6 = vld [vmem:[%s3941_s2] sm:$0xf] }
 0x136   :  { %1944 = vmatpush1.bf16.msra.mxu1 %v3453_v7  ;;  %v367_v5 = vsub.s32 0, %v3895_v4  ;;  %v371_v7 = vsub.s32 1, %v3895_v4 }
 0x137   :  { %1945 = vmatprep.subr.bf16.mxu1 %v3458_v8 }
 0x138   :  { %2438 = vmatpush1.bf16.msra.mxu0 %v3549_v9  ;;  %v368_v8 = vrot.slane %v3901_v6, %v367_v5 }
 0x139   :  { %2439 = vmatprep.subr.bf16.mxu0 %v3554_v10 }
 0x13a   :  { %1946 = vmatpush1.bf16.msra.mxu1 %v3456_v11 }
 0x13b   :  { %1947 = vmatprep.subr.bf16.mxu1 %v3461_v13 }
 0x13c   :  { %2440 = vmatpush1.bf16.msra.mxu0 %v3552_v14 }
 0x13d   :  { %2441 = vmatprep.subr.bf16.mxu0 %v3557_v16 }
 0x13e   :  { %1948 = vmatpush1.bf16.msra.mxu1 %v3459_v17 }
 0x13f   :  { %1949 = vmatprep.subr.bf16.mxu1 %v3464_v18 }
 0x140   :  { %2442 = vmatpush1.bf16.msra.mxu0 %v3555_v19 }
 0x141   :  { %2443 = vmatprep.subr.bf16.mxu0 %v3560_v20 }
 0x142   :  { %1950 = vmatpush1.bf16.msra.mxu1 %v3462_v21 }
 0x143   :  { %1951 = vmatprep.subr.bf16.mxu1 %v3467_v22 }
 0x144   :  { %2444 = vmatpush1.bf16.msra.mxu0 %v3558_v23 }
 0x145   :  { %2445 = vmatprep.subr.bf16.mxu0 %v3563_v15  ;;  %v3576_v15 = vld [vmem:[#allocation7 + $0x130] ss:$8 sps:$4 sm:$0xff]  }
 0x146   :  { %1952 = vmatpush1.bf16.msra.mxu1 %v3465_v25 }
 0x147   :  { %1953 = vmatprep.subr.bf16.mxu1 %v3470_v26 }
 0x148   :  { %2446 = vmatpush1.bf16.msra.mxu0 %v3561_v43  ;;  %v3623_v43 = vld [vmem:[#allocation8 + $0x60] sm:$0xff]  }
 0x149   :  { %2447 = vmatprep.subr.bf16.mxu0 %v3566_v46  ;;  %v3624_v46 = vld [vmem:[#allocation8 + $0x20] sm:$0xff]  }
 0x14a   :  { %1954 = vmatpush1.bf16.msra.mxu1 %v3468_v27 }
 0x14b   :  { %1966 = vmatprep.subr.bf16.mxu1 %v3473_v28 }
 0x14c   :  { %2448 = vmatpush1.bf16.msra.mxu0 %v3564_v48  ;;  %v3582_v48 = vld [vmem:[#allocation7 + $0x150] ss:$8 sps:$4 sm:$0xff]  }
 0x14d   :  { %1956 = vmatmul.mubr.bf16.vlgmr.msra.gmra.mrb[4].mxu1 %v3879_v24  ;;  %v3486_v24 = vld [vmem:[#allocation5 + $0x6a8] ss:$16 sps:$4 sm:$0xff]   ;;  %2460 = vmatprep.subr.bf16.mxu0 %v3569_v52 }
 0x14e   :  { %1967 = vmatpush1.bf16.msra.mxu1 %v3471_v29  ;;  %1998 = vmatprep.mubr.bf16.mxu1 %v3883_v33  ;;  %v3588_v52 = vld [vmem:[#allocation7 + $0x170] ss:$8 sps:$4 sm:$0xff]  }
 0x14f   :  { %1968 = vmatprep.subr.bf16.mxu1 %v3476_v30  ;;  %v3567_v30 = vld [vmem:[#allocation7 + $0x100] ss:$8 sps:$4 sm:$0xff]  }
 0x152   :  { %1969 = vmatpush1.bf16.msra.mxu1 %v3474_v32  ;;  %v3572_v32 = vld [vmem:[#allocation7 + $0x114] ss:$8 sps:$4 sm:$0xff]  }
 0x153   :  { %1970 = vmatprep.subr.bf16.mxu1 %v3479_v34  ;;  %v3615_v34 = vld [vmem:[#allocation8 + $0x40] sm:$0xff]  }
 0x156   :  { %1971 = vmatpush1.bf16.msra.mxu1 %v3477_v35  ;;  %v3616_v35 = vld [vmem:[#allocation8] sm:$0xff]  }
 0x157   :  { %1972 = vmatprep.subr.bf16.mxu1 %v3482_v12  ;;  %v3617_v12 = vld [vmem:[#allocation8 + $0x48] sm:$0xff]  }
 0x15a   :  { %1973 = vmatpush1.bf16.msra.mxu1 %v3480_v36  ;;  %v3570_v36 = vld [vmem:[#allocation7 + $0x110] ss:$8 sps:$4 sm:$0xff]  }
 0x15b   :  { %1974 = vmatprep.subr.bf16.mxu1 %v3485_v37  ;;  %v3575_v37 = vld [vmem:[#allocation7 + $0x124] ss:$8 sps:$4 sm:$0xff]  }
 0x15e   :  { %1975 = vmatpush1.bf16.msra.mxu1 %v3483_v38  ;;  %v3618_v38 = vld [vmem:[#allocation8 + $0x8] sm:$0xff]  }
 0x15f   :  { %1976 = vmatprep.subr.bf16.mxu1 %v3488_v39  ;;  %v3619_v39 = vld [vmem:[#allocation8 + $0x50] sm:$0xff]  }
 0x160   :  { %v1699_v41 = vpop.f32.mrb[0].mxu1 }
 0x161   :  { %v1701_v33 = vpop.f32.mrb[1].mxu1  ;;  %v1700_v9 = vadd.f32 %v1699_v41, %v368_v8  ;;  %v3620_v41 = vld [vmem:[#allocation8 + $0x10] sm:$0xff]  }
 0x162   :  { %v1703_v55 = vpop.f32.mrb[2].mxu1  ;;  %1977 = vmatpush1.bf16.msra.mxu1 %v3486_v24  ;;  %v3573_v24 = vld [vmem:[#allocation7 + $0x120] ss:$8 sps:$4 sm:$0xff]  }
 0x163   :  { %v1705_v44 = vpop.f32.mrb[3].mxu1  ;;  %1978 = vmatprep.subr.bf16.mxu1 %v3491_v40  ;;  %v1704_v13 = vadd.f32 %v1703_v55, %v368_v8  ;;  %v3578_v40 = vld [vmem:[#allocation7 + $0x134] ss:$8 sps:$4 sm:$0xff]   ;;  %v3581_v55 = vld [vmem:[#allocation7 + $0x144] ss:$8 sps:$4 sm:$0xff]  }
 0x164   :  { %v3614_v8 = vld [vmem:[#allocation7 + $0x1f4] ss:$8 sps:$4 sm:$0xff]  }
 0x166   :  { %1979 = vmatpush1.bf16.msra.mxu1 %v3489_v42  ;;  %v3622_v42 = vld [vmem:[#allocation8 + $0x18] sm:$0xff]  }
 0x167   :  { %1980 = vmatprep.subr.bf16.mxu1 %v3494_v45  ;;  %v3584_v45 = vld [vmem:[#allocation7 + $0x154] ss:$8 sps:$4 sm:$0xff]  }
 0x16a   :  { %1981 = vmatpush1.bf16.msra.mxu1 %v3492_v47  ;;  %v3625_v47 = vld [vmem:[#allocation8 + $0x68] sm:$0xff]  }
 0x16b   :  { %1982 = vmatprep.subr.bf16.mxu1 %v3497_v49  ;;  %v3587_v49 = vld [vmem:[#allocation7 + $0x164] ss:$8 sps:$4 sm:$0xff]  }
 0x16e   :  { %1983 = vmatpush1.bf16.msra.mxu1 %v3495_v50  ;;  %v3585_v50 = vld [vmem:[#allocation7 + $0x160] ss:$8 sps:$4 sm:$0xff]  }
 0x16f   :  { %1984 = vmatprep.subr.bf16.mxu1 %v3500_v51  ;;  %v3590_v51 = vld [vmem:[#allocation7 + $0x174] ss:$8 sps:$4 sm:$0xff]  }
 0x172   :  { %1985 = vmatpush1.bf16.msra.mxu1 %v3498_v53  ;;  %v3593_v53 = vld [vmem:[#allocation7 + $0x184] ss:$8 sps:$4 sm:$0xff]  }
 0x173   :  { %1986 = vmatprep.subr.bf16.mxu1 %v3503_v54  ;;  %v3591_v54 = vld [vmem:[#allocation7 + $0x180] ss:$8 sps:$4 sm:$0xff]  }
 0x176   :  { %1987 = vmatpush1.bf16.msra.mxu1 %v3501_v56  ;;  %v3596_v56 = vld [vmem:[#allocation7 + $0x194] ss:$8 sps:$4 sm:$0xff]  }
 0x177   :  { %1988 = vmatprep.subr.bf16.mxu1 %v3506_v57  ;;  %v3594_v57 = vld [vmem:[#allocation7 + $0x190] ss:$8 sps:$4 sm:$0xff]  }
 0x17a   :  { %1989 = vmatpush1.bf16.msra.mxu1 %v3504_v58  ;;  %v3599_v58 = vld [vmem:[#allocation7 + $0x1a4] ss:$8 sps:$4 sm:$0xff]  }
 0x17b   :  { %1990 = vmatprep.subr.bf16.mxu1 %v3509_v59  ;;  %v3597_v59 = vld [vmem:[#allocation7 + $0x1a0] ss:$8 sps:$4 sm:$0xff]  }
 0x17e   :  { %1991 = vmatpush1.bf16.msra.mxu1 %v3507_v60  ;;  %v3602_v60 = vld [vmem:[#allocation7 + $0x1b4] ss:$8 sps:$4 sm:$0xff]  }
 0x17f   :  { %1992 = vmatprep.subr.bf16.mxu1 %v3512_v61  ;;  %v3600_v61 = vld [vmem:[#allocation7 + $0x1b0] ss:$8 sps:$4 sm:$0xff]  }
 0x182   :  { %1993 = vmatpush1.bf16.msra.mxu1 %v3510_v62  ;;  %v3605_v62 = vld [vmem:[#allocation7 + $0x1c4] ss:$8 sps:$4 sm:$0xff]  }
 0x183   :  { %1994 = vmatprep.subr.bf16.mxu1 %v3515_v63  ;;  %v3603_v63 = vld [vmem:[#allocation7 + $0x1c0] ss:$8 sps:$4 sm:$0xff]  }
 0x186   :  { %1995 = vmatpush1.bf16.msra.mxu1 %v3513_v0  ;;  %v3608_v0 = vld [vmem:[#allocation7 + $0x1d4] ss:$8 sps:$4 sm:$0xff]  }
 0x187   :  { %1996 = vmatprep.subr.bf16.mxu1 %v3518_v1  ;;  %v3606_v1 = vld [vmem:[#allocation7 + $0x1d0] ss:$8 sps:$4 sm:$0xff]  }
 0x18a   :  { %1997 = vmatpush1.bf16.msra.mxu1 %v3516_v2  ;;  %v3611_v2 = vld [vmem:[#allocation7 + $0x1e4] ss:$8 sps:$4 sm:$0xff]  }
 0x18b   :  { %3061 = vmatprep.subr.bf16.mxu1 %v3615_v34  ;;  %v3629_v34 = vld [vmem:[#allocation8 + $0x78] sm:$0xff]  }
 0x18d   :  { %1999 = vmatmul.mubr.bf16.vlgmr.msra.gmra.mrb[4].mxu1 %v3887_v31  ;;  %v372_v31 = vrot.slane %v3901_v6, %v371_v7 }
 0x18e   :  { %3062 = vmatpush3.bf16.msra.mxu1 %v3616_v35  ;;  %v3630_v35 = vld [vmem:[#allocation8 + $0x38] sm:$0xff]  }
 0x18f   :  { %v1702_v10 = vadd.f32 %v1701_v33, %v372_v31  ;;  %v1706_v17 = vadd.f32 %v1705_v44, %v372_v31  ;;  %3063 = vmatprep.subr.bf16.mxu1 %v3617_v12  ;;  %v3621_v33 = vld [vmem:[#allocation8 + $0x58] sm:$0xff]   ;;  %v3579_v44 = vld [vmem:[#allocation7 + $0x140] ss:$8 sps:$4 sm:$0xff]  }
 0x190   :  { %v3612_v31 = vld [vmem:[#allocation7 + $0x1f0] ss:$8 sps:$4 sm:$0xff]   ;;  %v2085_v12 = vld [vmem:[%s3943_s4] sm:$0x3] }
 0x192   :  { %3064 = vmatpush3.bf16.msra.mxu1 %v3618_v38 }
 0x193   :  { %3065 = vmatprep.subr.bf16.mxu1 %v3619_v39 }
 0x196   :  { %3066 = vmatpush3.bf16.msra.mxu1 %v3620_v41 }
 0x197   :  { %3067 = vmatprep.subr.bf16.mxu1 %v3621_v33 }
 0x19a   :  { %3068 = vmatpush3.bf16.msra.mxu1 %v3622_v42 }
 0x19b   :  { %3069 = vmatprep.subr.bf16.mxu1 %v3623_v43 }
 0x19e   :  { %3070 = vmatpush3.bf16.msra.mxu1 %v3624_v46 }
 0x19f   :  { %3071 = vmatprep.subr.bf16.mxu1 %v3625_v47 }
 0x1e1   :  { %v1828_v11 = vpop.f32.mrb[0].mxu0 }
 0x1e2   :  { %v3084_v14 = vadd.f32 %v1828_v11, %v1700_v9  ;;  %v1830_v16 = vpop.f32.mrb[1].mxu0  ;;  %v375_v9 = vsub.s32 2, %v3895_v4 }
 0x1e3   :  { %v3086_v18 = vadd.f32 %v1830_v16, %v1702_v10  ;;  %v1832_v19 = vpop.f32.mrb[2].mxu0  ;;  %v379_v10 = vsub.s32 3, %v3895_v4  ;;  %v3044_v4 = vld [vmem:[%s3945_s6] ss:$0 sm:$0xff]  ;;  %s3768_s6 = smov [#allocation10]  }
 0x1e4   :  { %v3088_v20 = vadd.f32 %v1832_v19, %v1704_v13  ;;  %v1834_v21 = vpop.f32.mrb[3].mxu0  ;;  %v2009_v23 = vmax.f32 %v3084_v14, 0.0  ;;  %v376_v11 = vrot.slane %v3901_v6, %v375_v9  ;;  %s2710_s9 = sshll.u32 %s3768_s6, 4  ;;  %s2711_s9 = int_to_ptr.vmem [resolvable:$true] %s2710_s9 }
 0x1e5   :  { %v3090_v22 = vadd.f32 %v1834_v21, %v1706_v17  ;;  %v2010_v26 = vmax.f32 %v3086_v18, 0.0  ;;  %v380_v13 = vrot.slane %v3901_v6, %v379_v10  ;;  %v3628_v6 = vld [vmem:[#allocation8 + $0x30] sm:$0xff]   ;;  %s3727_s10 = scalar_lea.vmem %s2711_s9, 256  ;;  %p3732_p5 = scmp.lt.s32.totalorder %s2711_s9, %s2711_s9 }
 0x1e6   :  { %v2013_v25 = vmax.f32 %v3088_v20, 0.0  ;;  %p3728_p4 = scmp.ne.s32.totalorder %s2711_s9, %s3727_s10  ;;  %p3733_p6 = scmp.lt.s32.totalorder %s3727_s10, %s3727_s10 }
 0x1e7   :  { %v2014_v27 = vmax.f32 %v3090_v22, 0.0 }
 0x1e8   :  { %v2017_v28 = vpack.c.bf16 %v2013_v25, %v2009_v23  ;;  %p3734_p7 = por %p3733_p6, %p3732_p5 }
 0x1e9   :  { %v2018_v29 = vpack.c.bf16 %v2014_v27, %v2010_v26 }
 0x1ea   :  { %p3735_p8 = pnand %p3734_p7, %p3728_p4 }
 0x1eb   :  { %2449 = vmatprep.mubr.bf16.mxu0 %v2018_v29 }
 0x1ec   :  { %2450 = vmatmul.mubr.bf16.vlgmr.msra.gmra.mrb[4].mxu0 %v2017_v28 }
 0x1ed   :  { %2461 = vmatpush1.bf16.msra.mxu0 %v3567_v30  ;;  %v3626_v30 = vld [vmem:[#allocation8 + $0x28] sm:$0xff]  }
 0x1ee   :  { %2462 = vmatprep.subr.bf16.mxu0 %v3572_v32  ;;  %3072 = vmatpush3.bf16.msra.mxu1 %v3626_v30  ;;  %v3627_v32 = vld [vmem:[#allocation8 + $0x70] sm:$0xff]  }
 0x1ef   :  { %3073 = vmatprep.subr.bf16.mxu1 %v3627_v32 }
 0x1f1   :  { %2463 = vmatpush1.bf16.msra.mxu0 %v3570_v36  ;;  %v2090_v36 = vrot.slane %v2085_v12, %v367_v5 }
 0x1f2   :  { %2464 = vmatprep.subr.bf16.mxu0 %v3575_v37  ;;  %3074 = vmatpush3.bf16.msra.mxu1 %v3628_v6  ;;  %v2094_v37 = vrot.slane %v2085_v12, %v371_v7 }
 0x1f3   :  { %3075 = vmatprep.subr.bf16.mxu1 %v3629_v34 }
 0x1f5   :  { %2465 = vmatpush1.bf16.msra.mxu0 %v3573_v24 }
 0x1f6   :  { %2466 = vmatprep.subr.bf16.mxu0 %v3578_v40  ;;  %3076 = vmatpush3.bf16.msra.mxu1 %v3630_v35 }
 0x1f9   :  { %2467 = vmatpush1.bf16.msra.mxu0 %v3576_v15 }
 0x1fa   :  { %2468 = vmatprep.subr.bf16.mxu0 %v3581_v55 }
 0x1fd   :  { %2469 = vmatpush1.bf16.msra.mxu0 %v3579_v44 }
 0x1fe   :  { %2470 = vmatprep.subr.bf16.mxu0 %v3584_v45 }
 0x201   :  { %2471 = vmatpush1.bf16.msra.mxu0 %v3582_v48 }
 0x202   :  { %2472 = vmatprep.subr.bf16.mxu0 %v3587_v49 }
 0x205   :  { %2473 = vmatpush1.bf16.msra.mxu0 %v3585_v50 }
 0x206   :  { %2474 = vmatprep.subr.bf16.mxu0 %v3590_v51 }
 0x209   :  { %2475 = vmatpush1.bf16.msra.mxu0 %v3588_v52 }
 0x20a   :  { %2476 = vmatprep.subr.bf16.mxu0 %v3593_v53 }
 0x20d   :  { %2477 = vmatpush1.bf16.msra.mxu0 %v3591_v54 }
 0x20e   :  { %2478 = vmatprep.subr.bf16.mxu0 %v3596_v56 }
 0x211   :  { %2479 = vmatpush1.bf16.msra.mxu0 %v3594_v57 }
 0x212   :  { %2480 = vmatprep.subr.bf16.mxu0 %v3599_v58 }
 0x215   :  { %2481 = vmatpush1.bf16.msra.mxu0 %v3597_v59 }
 0x216   :  { %2482 = vmatprep.subr.bf16.mxu0 %v3602_v60 }
 0x219   :  { %2483 = vmatpush1.bf16.msra.mxu0 %v3600_v61 }
 0x21a   :  { %2484 = vmatprep.subr.bf16.mxu0 %v3605_v62 }
 0x21d   :  { %2485 = vmatpush1.bf16.msra.mxu0 %v3603_v63 }
 0x21e   :  { %2486 = vmatprep.subr.bf16.mxu0 %v3608_v0 }
 0x221   :  { %2487 = vmatpush1.bf16.msra.mxu0 %v3606_v1 }
 0x222   :  { %2488 = vmatprep.subr.bf16.mxu0 %v3611_v2 }
 0x225   :  { %2489 = vmatpush1.bf16.msra.mxu0 %v3609_v3 }
 0x226   :  { %2490 = vmatprep.subr.bf16.mxu0 %v3614_v8 }
 0x229   :  { %2491 = vmatpush1.bf16.msra.mxu0 %v3612_v31 }
 0x260   :  { %v2000_v14 = vpop.f32.mrb[4].mxu1 }
 0x261   :  { %v3091_v16 = vadd.f32 %v2000_v14, %v376_v11  ;;  %v2002_v17 = vpop.f32.mrb[5].mxu1 }
 0x262   :  { %v3092_v18 = vadd.f32 %v2002_v17, %v380_v13  ;;  %v2004_v19 = vpop.f32.mrb[6].mxu1 }
 0x263   :  { %v3093_v20 = vadd.f32 %v2004_v19, %v376_v11  ;;  %v2006_v21 = vpop.f32.mrb[7].mxu1  ;;  %v2011_v23 = vmax.f32 %v3091_v16, 0.0 }
 0x264   :  { %v3094_v22 = vadd.f32 %v2006_v21, %v380_v13  ;;  %v2012_v26 = vmax.f32 %v3092_v18, 0.0 }
 0x265   :  { %v2015_v25 = vmax.f32 %v3093_v20, 0.0 }
 0x266   :  { %v2016_v27 = vmax.f32 %v3094_v22, 0.0 }
 0x267   :  { %v2019_v28 = vpack.c.bf16 %v2015_v25, %v2011_v23 }
 0x268   :  { %v2020_v29 = vpack.c.bf16 %v2016_v27, %v2012_v26 }
 0x26a   :  { %2492 = vmatprep.mubr.bf16.mxu0 %v2020_v29 }
 0x26b   :  { %2493 = vmatmul.mubr.bf16.vlgmr.msra.gmra.mrb[4].mxu0 %v2019_v28 }
 0x33e   :  { %v2494_v38 = vpop.f32.mrb[4].mxu0 }
 0x33f   :  { %v3095_v39 = vadd.f32 %v2494_v38, %v2090_v36  ;;  %v2496_v24 = vpop.f32.mrb[5].mxu0 }
 0x340   :  { %v3096_v40 = vadd.f32 %v2496_v24, %v2094_v37  ;;  %v2498_v41 = vpop.f32.mrb[6].mxu0 }
 0x341   :  { %v3097_v33 = vadd.f32 %v2498_v41, %v2090_v36  ;;  %v2500_v15 = vpop.f32.mrb[7].mxu0  ;;  %v2503_v42 = vmax.f32 %v3095_v39, 0.0 }
 0x342   :  { %v3098_v55 = vadd.f32 %v2500_v15, %v2094_v37  ;;  %v2504_v44 = vmax.f32 %v3096_v40, 0.0 }
 0x343   :  { %v2505_v43 = vmax.f32 %v3097_v33, 0.0 }
 0x344   :  { %v2506_v45 = vmax.f32 %v3098_v55, 0.0 }
 0x345   :  { %v2507_v46 = vpack.c.bf16 %v2505_v43, %v2503_v42 }
 0x346   :  { %v2508_v47 = vpack.c.bf16 %v2506_v45, %v2504_v44 }
 0x348   :  { %2676 = vmatprep.mubr.bf16.mxu1 %v2508_v47 }
 0x349   :  { %2677 = vmatmul.mubr.bf16.vlgmr.msra.gmra.mrb[8].mxu1 %v2507_v46 }
 0x41c   :  { %v3077_v5 = vpop.f32.mrb[8].mxu1 }
 0x41d   :  { %v3078_v48 = vpop.f32.mrb[9].mxu1 }
 0x41e   :  { %v3079_v7 = vadd.f32 %v3078_v48, %v3077_v5  ;;  %v3080_v49 = vpop.f32.mrb[10].mxu1 }
 0x41f   :  { %v3081_v50 = vpop.f32.mrb[11].mxu1 }
 0x420   :  { %v3082_v51 = vadd.f32 %v3081_v50, %v3080_v49  ;;  %v2679_v52 = vadd.f32 %v3079_v7, %v3044_v4 }
 0x422   :  { %2685 = vmax.xlane.f32.xlu0 %v2679_v52  ;;  %v2682_v53 = vadd.f32 %v3082_v51, %v3044_v4 }
 0x426   :  { %2687 = vmax.xlane.f32.xlu0 %v2682_v53 }
 0x4af   :  { %v2686_v54 = vpop.xlane.xlu0 %2685 }
 0x4b0   :  { %v2689_v56 = vsub.f32 %v2679_v52, %v2686_v54 }
 0x4b2   :  { %v2691_v57 = vmul.f32 1.442695, %v2689_v56 }
 0x4b3   :  { %v2688_v58 = vpop.xlane.xlu0 %2687 }
 0x4b4   :  { %3631 = vpow2.f32 %v2691_v57  ;;  %v2690_v59 = vsub.f32 %v2682_v53, %v2688_v58 }
 0x4b6   :  { %v2693_v60 = vmul.f32 1.442695, %v2690_v59 }
 0x4b8   :  { %3633 = vpow2.f32 %v2693_v60 }
 0x4be   :  { %v3632_v61 = vpop.eup %3631 }
 0x4bf   :  { %2695 = vadd.xlane.f32.xlu1 %v3632_v61 }
 0x4c2   :  { %v3634_v62 = vpop.eup %3633 }
 0x4c3   :  { %2697 = vadd.xlane.f32.xlu1 %v3634_v62 }
 0x54c   :  { %v2696_v63 = vpop.xlane.xlu1 %2695 }
 0x54d   :  { %3635 = vrcp.f32 %v2696_v63 }
 0x550   :  { %v2698_v0 = vpop.xlane.xlu1 %2697 }
 0x551   :  { %3637 = vrcp.f32 %v2698_v0 }
 0x557   :  { %v3636_v1 = vpop.eup %3635 }
 0x558   :  { %v2700_v2 = vmul.f32 %v3636_v1, %v3632_v61 }
 0x55a   :  { %2703 = vst [vmem:[#allocation10] sm:$0xff] %v2700_v2 }
 0x55b   :  { %v3638_v3 = vpop.eup %3637 }
 0x55c   :  { %v2702_v8 = vmul.f32 %v3638_v3, %v3634_v62 }
 0x55e   :  { %2704 = vst [vmem:[#allocation10 + $0x8] sm:$0xff] %v2702_v8 }
 0x55f   :  { %3738 = shalt.err (!%p3735_p8)
}
 0x560   :  { %s3739_s13 = scalar_lea.hbm %s3946_s7, 256 }
 0x561   :  { %p3740_p9 = scmp.ne.s32.totalorder %s3946_s7, %s3739_s13  ;;  %p3743_p10 = scmp.lt.u32.totalorder %s3739_s13, %s3946_s7 }
 0x563   :  { %p3745_p11 = pnand %p3743_p10, %p3740_p9 }
 0x565   :  { %3748 = shalt.err (!%p3745_p11)
}
 0x566   :  { %2716 = dma.vmem_to_hbm [thread:$0]  %s2711_s9, 256, %s3946_s7, [#allocation4], %s3764_s0, %s3764_s0, %s3765_s15  }
 0x567   :  { %3755 = dma.done.wait [#allocation4], 256  }
 0x568   :  { %3756 = vsyncadd [#allocation4], 4294967040 }
 0x569   :  { %2720 = vsyncpa [#allocation3], 1 }
 0x56a   :  { %2721 = vsyncpa [#allocation6], 1 }
 0x56b   :  { %2722 = vsyncpa [#allocation9], 1 }
 0x56c   :  { %2723 = vsyncpa [#allocation4], 1 }

</bundles_post_ra>
